<compile_context>
chip_gen: v7x
topology: tpu7x:2x2x1
jax: 0.10.0
libtpu: 0.0.40
codegen_flags: <defaults>
</compile_context>

<pallas_src>
import random
import functools

import numpy as np
import jax
import jax.numpy as jnp
from jax.experimental import pallas as pl
from jax.experimental.pallas import tpu as pltpu


_LANE = 128
_SUBLANE = 8


def _ceil_to(x, m):
    return ((x + m - 1) // m) * m


# ----------------------------------------------------------------------------
# Pallas kernels
# ----------------------------------------------------------------------------

def _scorer_kernel(x_ref, w1_ref, b1_ref, w2_ref, b2_ref, probs_ref, *, num_valid):
    """scorer = Linear(2H,H) -> ReLU -> <.,w2>+b2, masked softmax over instances.

    The (H -> 1) second layer is a VPU multiply + lane reduction (no width-1
    MXU matmul); the output is written lane-dense as (Mp, 128) with the
    probability broadcast across lanes (full, unmasked vreg store).
    """
    x = x_ref[...]                                                    # (Mp, 2Hp)
    h = jnp.dot(x, w1_ref[...], preferred_element_type=jnp.float32) + b1_ref[...]
    h = jnp.maximum(h, 0.0)                                           # ReLU
    s = jnp.sum(h * w2_ref[...], axis=-1, keepdims=True) + b2_ref[...]  # (Mp, 1)
    row = jax.lax.broadcasted_iota(jnp.int32, s.shape, 0)
    valid = row < num_valid
    s = jnp.where(valid, s, -jnp.inf)
    m = jnp.max(s, axis=0, keepdims=True)
    e = jnp.where(valid, jnp.exp(s - m), 0.0)
    p = e / jnp.sum(e, axis=0, keepdims=True)
    probs_ref[...] = jnp.broadcast_to(p, probs_ref.shape)


def _agent_step_kernel(sel_ref,                      # SMEM (num_sample,) int32
                       x_ref,                        # (R, 2Hp)   resident
                       selg_ref, seld_ref,           # (1, 1, Hp) per sample
                       wih1_ref, whh1_ref, bih1_ref, bhh1_ref,
                       wih2_ref, whh2_ref, bih2_ref, bhh2_ref,
                       clsw_ref, clsb_ref,
                       dec_out_ref, logits_out_ref,  # (1,R,Hp) / (1,R,Cp)
                       *, cand_max):
    """One sample of the decision-refinement step, for ALL instances at once.

    Two chained PyTorch-semantics GRUCells (gate order r,z,n). The hidden
    state of each cell is a single broadcast row, so the W_hh matmuls are
    (1,Hp)@(Hp,3Hp). Rows belonging to the selected instance keep their
    original decision vectors; the classifier is fused at the tail.
    """
    Hp = seld_ref.shape[-1]
    x = x_ref[...]                                   # (R, 2Hp) = [dec | gloss]
    R = x.shape[0]
    dec_orig = x[:, :Hp]                             # lane-aligned slice

    # --- GRU1: input = [target_decision ; target_gloss], hidden = selected gloss
    h1 = selg_ref[0]                                 # (1, Hp)
    gi = jnp.dot(x, wih1_ref[...], preferred_element_type=jnp.float32) + bih1_ref[...]
    gh = jnp.dot(h1, whh1_ref[...], preferred_element_type=jnp.float32) + bhh1_ref[...]
    r = jax.nn.sigmoid(gi[:, 0:Hp] + gh[:, 0:Hp])
    z = jax.nn.sigmoid(gi[:, Hp:2 * Hp] + gh[:, Hp:2 * Hp])
    n = jnp.tanh(gi[:, 2 * Hp:] + r * gh[:, 2 * Hp:])
    prop = (1.0 - z) * n + z * h1                    # (R, Hp), h1 broadcast

    # --- GRU2: input = proposal, hidden = selected decision vec
    h2 = seld_ref[0]                                 # (1, Hp)
    gi2 = jnp.dot(prop, wih2_ref[...], preferred_element_type=jnp.float32) + bih2_ref[...]
    gh2 = jnp.dot(h2, whh2_ref[...], preferred_element_type=jnp.float32) + bhh2_ref[...]
    r2 = jax.nn.sigmoid(gi2[:, 0:Hp] + gh2[:, 0:Hp])
    z2 = jax.nn.sigmoid(gi2[:, Hp:2 * Hp] + gh2[:, Hp:2 * Hp])
    n2 = jnp.tanh(gi2[:, 2 * Hp:] + r2 * gh2[:, 2 * Hp:])
    upd = (1.0 - z2) * n2 + z2 * h2                  # (R, Hp)

    # --- selected instance keeps its original decision vectors
    sel = sel_ref[pl.program_id(0)]
    row = jax.lax.broadcasted_iota(jnp.int32, (R, 1), 0)
    keep = jnp.logical_and(row >= sel * cand_max, row < (sel + 1) * cand_max)
    new_dec = jnp.where(keep, dec_orig, upd)

    dec_out_ref[0] = new_dec
    # --- fused classifier
    logits_out_ref[0] = (jnp.dot(new_dec, clsw_ref[...],
                                 preferred_element_type=jnp.float32) + clsb_ref[...])


# ----------------------------------------------------------------------------
# Parameter handling (padded, gate/lane-aligned layout)
# ----------------------------------------------------------------------------

def _pad_chunked(w, in_chunk, out_chunk, in_pad, out_pad):
    """Pad each (in_chunk, out_chunk) sub-block of w to (in_pad, out_pad)."""
    n_in = w.shape[0] // in_chunk
    n_out = w.shape[1] // out_chunk
    out = jnp.zeros((n_in * in_pad, n_out * out_pad), jnp.float32)
    for i in range(n_in):
        for j in range(n_out):
            blk = w[i * in_chunk:(i + 1) * in_chunk, j * out_chunk:(j + 1) * out_chunk]
            out = out.at[i * in_pad:i * in_pad + in_chunk,
                         j * out_pad:j * out_pad + out_chunk].set(blk)
    return out


def init_agent_params(key, hidden_size, num_classes=2):
    """Deterministic synthetic init (shapes match the PyTorch module)."""
    H = hidden_size
    ks = jax.random.split(key, 16)
    s = 0.1

    def w(k, shape):
        return (s * jax.random.normal(k, shape)).astype(jnp.float32)

    params = {
        # scorer: Linear(2H, H) -> ReLU -> Linear(H, 1)
        'scorer_w1': w(ks[0], (2 * H, H)), 'scorer_b1': w(ks[1], (1, H)),
        'scorer_w2': w(ks[2], (H, 1)),     'scorer_b2': w(ks[3], (1, 1)),
        # gru1: GRUCell(input=2H, hidden=H) — weights stored (in, 3H)
        'gru1_wih': w(ks[4], (2 * H, 3 * H)), 'gru1_whh': w(ks[5], (H, 3 * H)),
        'gru1_bih': w(ks[6], (1, 3 * H)),     'gru1_bhh': w(ks[7], (1, 3 * H)),
        # gru2: GRUCell(input=H, hidden=H)
        'gru2_wih': w(ks[8], (H, 3 * H)),  'gru2_whh': w(ks[9], (H, 3 * H)),
        'gru2_bih': w(ks[10], (1, 3 * H)), 'gru2_bhh': w(ks[11], (1, 3 * H)),
        # V1 / V2 / U exist in __init__ but are unused in forward.
        'V1_w': w(ks[12], (2 * H, H)), 'V2_w': w(ks[13], (2 * H, H)),
        'U_w': w(ks[14], (H, H)),
        # classifier = copy.deepcopy(init_classifier): synthetic Linear(H, C)
        'cls_w': w(ks[15], (H, num_classes)),
        'cls_b': jnp.zeros((1, num_classes), jnp.float32),
    }
    return params


def pad_agent_params(params, hidden_size, num_classes):
    """One-time padding to the lane/gate-aligned layout used by the kernels."""
    H, C = hidden_size, num_classes
    Hp = _ceil_to(H, _LANE)
    Cp = _ceil_to(C, _LANE)
    pp = {
        'scorer_w1': _pad_chunked(params['scorer_w1'], H, H, Hp, Hp),   # (2Hp, Hp)
        'scorer_b1': _pad_chunked(params['scorer_b1'], 1, H, 1, Hp),    # (1, Hp)
        'scorer_w2': _pad_chunked(params['scorer_w2'].T, 1, H, 1, Hp),  # (1, Hp) row
        'scorer_b2': jnp.asarray(params['scorer_b2'], jnp.float32),     # (1, 1)
        'gru1_wih': _pad_chunked(params['gru1_wih'], H, H, Hp, Hp),     # (2Hp, 3Hp)
        'gru1_whh': _pad_chunked(params['gru1_whh'], H, H, Hp, Hp),     # (Hp, 3Hp)
        'gru1_bih': _pad_chunked(params['gru1_bih'], 1, H, 1, Hp),      # (1, 3Hp)
        'gru1_bhh': _pad_chunked(params['gru1_bhh'], 1, H, 1, Hp),
        'gru2_wih': _pad_chunked(params['gru2_wih'], H, H, Hp, Hp),
        'gru2_whh': _pad_chunked(params['gru2_whh'], H, H, Hp, Hp),
        'gru2_bih': _pad_chunked(params['gru2_bih'], 1, H, 1, Hp),
        'gru2_bhh': _pad_chunked(params['gru2_bhh'], 1, H, 1, Hp),
        'cls_w': _pad_chunked(params['cls_w'], H, C, Hp, Cp),           # (Hp, Cp)
        'cls_b': _pad_chunked(params['cls_b'], 1, C, 1, Cp),            # (1, Cp)
    }
    meta = {'H': H, 'C': C, 'Hp': Hp, 'Cp': Cp}
    return pp, meta


# ----------------------------------------------------------------------------
# Device-side forward (one compile per (H, C, num_inst, cand_max, num_sample))
# ----------------------------------------------------------------------------

@functools.lru_cache(maxsize=None)
def _get_device_forward(H, C, num_inst, cand_max, num_sample):
    Hp = _ceil_to(H, _LANE)
    Cp = _ceil_to(C, _LANE)
    Mp = _ceil_to(num_inst, _SUBLANE)
    R = num_inst * cand_max                    # cand_max is a multiple of 8

    vmem = pl.BlockSpec(memory_space=pltpu.MemorySpace.VMEM)
    scorer_call = pl.pallas_call(
        functools.partial(_scorer_kernel, num_valid=num_inst),
        out_shape=jax.ShapeDtypeStruct((Mp, _LANE), jnp.float32),
        in_specs=[vmem] * 5,
        out_specs=vmem,
    )

    def _resident(shape):
        zeros = (0,) * len(shape)
        return pl.BlockSpec(shape, lambda s, sel, _z=zeros: _z)

    def _per_sample(shape):
        rest = (0,) * (len(shape) - 1)
        return pl.BlockSpec(shape, lambda s, sel, _r=rest: (s,) + _r)

    grid_spec = pltpu.PrefetchScalarGridSpec(
        num_scalar_prefetch=1,                 # selected-instance ids -> SMEM
        grid=(num_sample,),
        in_specs=(
            _resident((R, 2 * Hp)),            # x = [dec | gloss], DMA'd once
            _per_sample((1, 1, Hp)),           # selected gloss vec
            _per_sample((1, 1, Hp)),           # selected decision vec
            _resident((2 * Hp, 3 * Hp)),       # gru1 W_ih (resident)
            _resident((Hp, 3 * Hp)),           # gru1 W_hh
            _resident((1, 3 * Hp)),            # gru1 b_ih
            _resident((1, 3 * Hp)),            # gru1 b_hh
            _resident((Hp, 3 * Hp)),           # gru2 W_ih
            _resident((Hp, 3 * Hp)),           # gru2 W_hh
            _resident((1, 3 * Hp)),            # gru2 b_ih
            _resident((1, 3 * Hp)),            # gru2 b_hh
            _resident((Hp, Cp)),               # classifier W
            _resident((1, Cp)),                # classifier b
        ),
        out_specs=(
            _per_sample((1, R, Hp)),           # updated decision vecs
            _per_sample((1, R, Cp)),           # fused classifier logits
        ),
    )
    step_call = pl.pallas_call(
        functools.partial(_agent_step_kernel, cand_max=cand_max),
        out_shape=(jax.ShapeDtypeStruct((num_sample, R, Hp), jnp.float32),
                   jax.ShapeDtypeStruct((num_sample, R, Cp), jnp.float32)),
        grid_spec=grid_spec,
        compiler_params=pltpu.CompilerParams(
            dimension_semantics=("parallel",)),   # samples independent (v7x: 2 TCs)
    )

    def forward(pp, dec_flat, gls_flat, gather_idx, row_mask, lens, pred, key):
        # Fixed-bucket padded layout (num_inst, cand_max, Hp): one compile per config.
        dec_p = dec_flat[gather_idx] * row_mask[..., None]
        gls_p = gls_flat[gather_idx] * row_mask[..., None]
        dec_p = jnp.pad(dec_p, ((0, 0), (0, 0), (0, Hp - H)))
        gls_p = jnp.pad(gls_p, ((0, 0), (0, 0), (0, Hp - H)))

        # choose_next pooling: predicted candidate minus mean over real candidates.
        iar = jnp.arange(num_inst)
        pred_dec = dec_p[iar, pred]
        pred_gls = gls_p[iar, pred]
        mean_dec = dec_p.sum(axis=1) / lens[:, None]
        mean_gls = gls_p.sum(axis=1) / lens[:, None]
        x_sc = jnp.concatenate([pred_dec - mean_dec, pred_gls - mean_gls], axis=-1)
        x_sc = jnp.pad(x_sc, ((0, Mp - num_inst), (0, 0)))

        probs_full = scorer_call(x_sc, pp['scorer_w1'], pp['scorer_b1'],
                                 pp['scorer_w2'], pp['scorer_b2'])
        probs = probs_full[:num_inst, 0]

        # Device-side sampling of the selected instance for all samples at once
        # (replaces the host random_pick round-trip; same categorical law).
        sel_idx = jax.random.categorical(
            key, jnp.log(probs), shape=(num_sample,)).astype(jnp.int32)

        sel_cand = pred[sel_idx]
        selg = gls_p[sel_idx, sel_cand][:, None, :]     # (S, 1, Hp)
        seld = dec_p[sel_idx, sel_cand][:, None, :]     # (S, 1, Hp)

        x = jnp.concatenate([dec_p.reshape(R, Hp), gls_p.reshape(R, Hp)], axis=-1)

        dec_out, logits_out = step_call(
            sel_idx, x, selg, seld,
            pp['gru1_wih'], pp['gru1_whh'], pp['gru1_bih'], pp['gru1_bhh'],
            pp['gru2_wih'], pp['gru2_whh'], pp['gru2_bih'], pp['gru2_bhh'],
            pp['cls_w'], pp['cls_b'])
        return probs, sel_idx, dec_out, logits_out

    return jax.jit(forward)


# ----------------------------------------------------------------------------
# Agent forward (single-step-train), mirroring the PyTorch control flow
# ----------------------------------------------------------------------------

def random_pick(some_list, probabilities):
    """Host sampler from the original module (kept for parity; the hot path
    uses jax.random.categorical on device instead)."""
    x = random.uniform(0, 1)
    cumulative_probability = 0.0
    item = some_list[-1]
    for item, item_probability in zip(some_list, probabilities):
        cumulative_probability += item_probability
        if x < cumulative_probability:
            break
    return item


def agent_forward_single_step(padded_params, meta, init_all_decision_vecs,
                              mention_aware_gloss, sep_pos, init_pred_list,
                              num_sample=5, rng_key=None,
                              return_updated_decisions=False):
    """mode='single-step-train' path of Agent.forward."""
    H, C = meta['H'], meta['C']
    num_inst = len(sep_pos) - 1
    lens = [int(sep_pos[i + 1] - sep_pos[i]) for i in range(num_inst)]
    cand_max = _ceil_to(max(lens), _SUBLANE)    # bucketed -> no per-shape recompiles

    gather_idx = np.zeros((num_inst, cand_max), np.int32)
    row_mask = np.zeros((num_inst, cand_max), np.float32)
    real_rows = []
    for i, L in enumerate(lens):
        gather_idx[i, :L] = np.arange(sep_pos[i], sep_pos[i] + L)
        row_mask[i, :L] = 1.0
        real_rows.extend(range(i * cand_max, i * cand_max + L))
    real_rows = np.asarray(real_rows, np.int32)

    if rng_key is None:
        rng_key = jax.random.PRNGKey(random.getrandbits(31))

    fwd = _get_device_forward(H, C, num_inst, cand_max, num_sample)
    probs, sel_idx, dec_out, logits_out = fwd(
        padded_params, init_all_decision_vecs, mention_aware_gloss,
        jnp.asarray(gather_idx), jnp.asarray(row_mask),
        jnp.asarray(lens, jnp.float32), jnp.asarray(init_pred_list, jnp.int32),
        rng_key)

    new_logits_list = [logits_out[s, real_rows, :C] for s in range(num_sample)]
    selected_instance_idx_list = [int(i) for i in np.asarray(sel_idx)]
    if return_updated_decisions:
        upd_dec_list = [dec_out[s, real_rows, :H] for s in range(num_sample)]
        return new_logits_list, probs, selected_instance_idx_list, upd_dec_list
    return new_logits_list, probs, selected_instance_idx_list


# ----------------------------------------------------------------------------
# Pure-JAX references (for correctness spot-checks)
# ----------------------------------------------------------------------------

def _scorer_ref(x, w1, b1, w2, b2):
    h = jnp.maximum(x @ w1 + b1, 0.0)
    s = h @ w2 + b2
    return jax.nn.softmax(s[:, 0], axis=0)


def _gru_cell_ref(x, h, wih, whh, bih, bhh):
    H = h.shape[1]
    gi = x @ wih + bih
    gh = h @ whh + bhh
    r = jax.nn.sigmoid(gi[:, :H] + gh[:, :H])
    z = jax.nn.sigmoid(gi[:, H:2 * H] + gh[:, H:2 * H])
    n = jnp.tanh(gi[:, 2 * H:] + r * gh[:, 2 * H:])
    return (1.0 - z) * n + z * h


def _update_ref(params, sel_dec, sel_gls, tgt_dec, tgt_gls):
    x = jnp.concatenate([tgt_dec, tgt_gls], axis=-1)
    N = x.shape[0]
    h1 = jnp.broadcast_to(sel_gls[None, :], (N, sel_gls.shape[0]))
    prop = _gru_cell_ref(x, h1, params['gru1_wih'], params['gru1_whh'],
                         params['gru1_bih'], params['gru1_bhh'])
    h2 = jnp.broadcast_to(sel_dec[None, :], (N, sel_dec.shape[0]))
    return _gru_cell_ref(prop, h2, params['gru2_wih'], params['gru2_whh'],
                         params['gru2_bih'], params['gru2_bhh'])


# ----------------------------------------------------------------------------
# Demo
# ----------------------------------------------------------------------------

if __name__ == "__main__":
    random.seed(0)
    H = 32                       # hidden_size
    num_inst = 3
    cands = 4                    # candidates per instance
    num_classes = 2
    total = num_inst * cands
    sep_pos = [i * cands for i in range(num_inst + 1)]   # [0, 4, 8, 12]
    init_pred_list = [0, 1, 2]
    num_sample = 2

    key = jax.random.PRNGKey(0)
    k_params, k_dec, k_gls, k_sample = jax.random.split(key, 4)
    params = init_agent_params(k_params, H, num_classes=num_classes)
    padded_params, meta = pad_agent_params(params, H, num_classes)
    init_all_decision_vecs = jax.random.normal(k_dec, (total, H), jnp.float32)
    mention_aware_gloss = jax.random.normal(k_gls, (total, H), jnp.float32)

    # Run the single-step-train forward (one scorer launch + one batched
    # GRU/classifier launch for all samples & instances).
    (new_logits_list, next_sample_probs,
     selected_idx_list, upd_dec_list) = agent_forward_single_step(
        padded_params, meta, init_all_decision_vecs, mention_aware_gloss,
        sep_pos, init_pred_list, num_sample=num_sample, rng_key=k_sample,
        return_updated_decisions=True)

    jax.block_until_ready(new_logits_list)
    jax.block_until_ready(next_sample_probs)

    # ---- correctness spot-checks vs pure-JAX references ----
    dec_list = [init_all_decision_vecs[sep_pos[i]:sep_pos[i + 1]] for i in range(num_inst)]
    gls_list = [mention_aware_gloss[sep_pos[i]:sep_pos[i + 1]] for i in range(num_inst)]

    pooled_d = jnp.stack([d[p] - d.mean(axis=0) for d, p in zip(dec_list, init_pred_list)])
    pooled_g = jnp.stack([g[p] - g.mean(axis=0) for g, p in zip(gls_list, init_pred_list)])
    xin = jnp.concatenate([pooled_d, pooled_g], axis=-1)
    probs_ref = _scorer_ref(xin, params['scorer_w1'], params['scorer_b1'],
                            params['scorer_w2'], params['scorer_b2'])
    np.testing.assert_allclose(np.asarray(next_sample_probs), np.asarray(probs_ref),
                               rtol=1e-4, atol=1e-5)

    for s, sel in enumerate(selected_idx_list):
        sel_dec = dec_list[sel][init_pred_list[sel]]
        sel_gls = gls_list[sel][init_pred_list[sel]]
        ref_dec = []
        for i in range(num_inst):
            if i == sel:
                ref_dec.append(dec_list[i])
            else:
                ref_dec.append(_update_ref(params, sel_dec, sel_gls,
                                           dec_list[i], gls_list[i]))
        ref_cat = jnp.concatenate(ref_dec, axis=0)
        ref_logits = ref_cat @ params['cls_w'] + params['cls_b']
        np.testing.assert_allclose(np.asarray(upd_dec_list[s]), np.asarray(ref_cat),
                                   rtol=1e-4, atol=1e-5)
        np.testing.assert_allclose(np.asarray(new_logits_list[s]),
                                   np.asarray(ref_logits), rtol=1e-3, atol=1e-4)

    assert len(new_logits_list) == num_sample
    assert new_logits_list[0].shape == (total, num_classes)
    assert next_sample_probs.shape == (num_inst,)
    assert len(selected_idx_list) == num_sample

    print("KERNEL_OK")
</pallas_src>

<mosaic_0001>
module attributes {stable_mosaic.version = 11 : i64} {
  func.func @_scorer_kernel(%arg0: memref<8x256xf32, #tpu.memory_space<vmem>>, %arg1: memref<256x128xf32, #tpu.memory_space<vmem>>, %arg2: memref<1x128xf32, #tpu.memory_space<vmem>>, %arg3: memref<1x128xf32, #tpu.memory_space<vmem>>, %arg4: memref<1x1xf32, #tpu.memory_space<vmem>>, %arg5: memref<8x128xf32, #tpu.memory_space<vmem>>) attributes {dimension_semantics = [], scalar_prefetch = 0 : i64, scratch_operands = 0 : i64, tpu.core_type = #tpu.core_type<tc>} {
    %c0 = arith.constant 0 : index
    %c0_0 = arith.constant 0 : index
    %0 = vector.load %arg0[%c0, %c0_0] : memref<8x256xf32, #tpu.memory_space<vmem>>, vector<8x256xf32>
    %c0_1 = arith.constant 0 : index
    %c0_2 = arith.constant 0 : index
    %1 = vector.load %arg1[%c0_1, %c0_2] : memref<256x128xf32, #tpu.memory_space<vmem>>, vector<256x128xf32>
    %cst = arith.constant dense<0.000000e+00> : vector<8x128xf32>
    %2 = tpu.matmul %0, %1, %cst {dimension_numbers = #tpu.dot_dimension_numbers<[1], [0], [0], [1], [0, 0, 1, 1], [], []>} : vector<8x256xf32>, vector<256x128xf32>, vector<8x128xf32> -> vector<8x128xf32>
    %c0_3 = arith.constant 0 : index
    %c0_4 = arith.constant 0 : index
    %3 = vector.load %arg2[%c0_3, %c0_4] : memref<1x128xf32, #tpu.memory_space<vmem>>, vector<1x128xf32>
    %4 = vector.broadcast %3 : vector<1x128xf32> to vector<8x128xf32>
    %5 = arith.addf %2, %4 : vector<8x128xf32>
    %cst_5 = arith.constant 0.000000e+00 : f32
    %6 = vector.broadcast %cst_5 : f32 to vector<8x128xf32>
    %7 = arith.maximumf %5, %6 : vector<8x128xf32>
    %c0_6 = arith.constant 0 : index
    %c0_7 = arith.constant 0 : index
    %8 = vector.load %arg3[%c0_6, %c0_7] : memref<1x128xf32, #tpu.memory_space<vmem>>, vector<1x128xf32>
    %9 = vector.broadcast %8 : vector<1x128xf32> to vector<8x128xf32>
    %10 = arith.mulf %7, %9 : vector<8x128xf32>
    %cst_8 = arith.constant dense<0.000000e+00> : vector<8xf32>
    %11 = vector.multi_reduction <add>, %10, %cst_8 [1] : vector<8x128xf32> to vector<8xf32>
    %12 = vector.shape_cast %11 : vector<8xf32> to vector<8x1xf32>
    %c0_9 = arith.constant 0 : index
    %c0_10 = arith.constant 0 : index
    %13 = vector.load %arg4[%c0_9, %c0_10] : memref<1x1xf32, #tpu.memory_space<vmem>>, vector<1x1xf32>
    %14 = vector.broadcast %13 : vector<1x1xf32> to vector<8x1xf32>
    %15 = arith.addf %12, %14 : vector<8x1xf32>
    %16 = tpu.iota {dimensions = array<i32: 0>} : vector<8x1xi32>
    %c3_i32 = arith.constant 3 : i32
    %17 = vector.broadcast %c3_i32 : i32 to vector<8x1xi32>
    %18 = arith.cmpi slt, %16, %17 : vector<8x1xi32>
    %cst_11 = arith.constant 0xFF800000 : f32
    %19 = vector.broadcast %cst_11 : f32 to vector<8x1xf32>
    %20 = arith.select %18, %15, %19 : vector<8x1xi1>, vector<8x1xf32>
    %cst_12 = arith.constant dense<0xFF800000> : vector<1xf32>
    %21 = vector.multi_reduction <maximumf>, %20, %cst_12 [0] : vector<8x1xf32> to vector<1xf32>
    %22 = vector.shape_cast %21 : vector<1xf32> to vector<1x1xf32>
    %23 = vector.broadcast %22 : vector<1x1xf32> to vector<8x1xf32>
    %24 = arith.subf %20, %23 : vector<8x1xf32>
    %25 = math.exp %24 : vector<8x1xf32>
    %cst_13 = arith.constant 0.000000e+00 : f32
    %26 = vector.broadcast %cst_13 : f32 to vector<8x1xf32>
    %27 = arith.select %18, %25, %26 : vector<8x1xi1>, vector<8x1xf32>
    %cst_14 = arith.constant dense<0.000000e+00> : vector<1xf32>
    %28 = vector.multi_reduction <add>, %27, %cst_14 [0] : vector<8x1xf32> to vector<1xf32>
    %29 = vector.shape_cast %28 : vector<1xf32> to vector<1x1xf32>
    %30 = vector.broadcast %29 : vector<1x1xf32> to vector<8x1xf32>
    %31 = arith.divf %27, %30 : vector<8x1xf32>
    %32 = vector.shape_cast %31 : vector<8x1xf32> to vector<8x1xf32>
    %33 = vector.broadcast %32 : vector<8x1xf32> to vector<8x128xf32>
    %c0_15 = arith.constant 0 : index
    %c0_16 = arith.constant 0 : index
    %34 = vector.load %arg5[%c0_15, %c0_16] : memref<8x128xf32, #tpu.memory_space<vmem>>, vector<8x128xf32>
    tpu.vector_store %arg5[%c0_15, %c0_16], %33 {strides = array<i32>} : memref<8x128xf32, #tpu.memory_space<vmem>>, vector<8x128xf32>,
    return
  }
}

module attributes {stable_mosaic.version = 11 : i64} {
  func.func @_agent_step_kernel(%arg0: i32, %arg1: memref<2xi32, #tpu.memory_space<smem>>, %arg2: memref<24x256xf32, #tpu.memory_space<vmem>>, %arg3: memref<1x1x128xf32, #tpu.memory_space<vmem>>, %arg4: memref<1x1x128xf32, #tpu.memory_space<vmem>>, %arg5: memref<256x384xf32, #tpu.memory_space<vmem>>, %arg6: memref<128x384xf32, #tpu.memory_space<vmem>>, %arg7: memref<1x384xf32, #tpu.memory_space<vmem>>, %arg8: memref<1x384xf32, #tpu.memory_space<vmem>>, %arg9: memref<128x384xf32, #tpu.memory_space<vmem>>, %arg10: memref<128x384xf32, #tpu.memory_space<vmem>>, %arg11: memref<1x384xf32, #tpu.memory_space<vmem>>, %arg12: memref<1x384xf32, #tpu.memory_space<vmem>>, %arg13: memref<128x128xf32, #tpu.memory_space<vmem>>, %arg14: memref<1x128xf32, #tpu.memory_space<vmem>>, %arg15: memref<1x24x128xf32, #tpu.memory_space<vmem>>, %arg16: memref<1x24x128xf32, #tpu.memory_space<vmem>>) attributes {dimension_semantics = [#tpu.dimension_semantics<parallel>], iteration_bounds = array<i64: 2>, scalar_prefetch = 1 : i64, scratch_operands = 0 : i64, tpu.core_type = #tpu.core_type<tc>, window_params = [{pipeline_mode = #tpu.pipeline_mode<synchronous>, transform_indices = @transform_0, window_bounds = array<i64: 24, 256>}, {transform_indices = @transform_1, window_bounds = array<i64: 1, 1, 128>}, {transform_indices = @transform_2, window_bounds = array<i64: 1, 1, 128>}, {pipeline_mode = #tpu.pipeline_mode<synchronous>, transform_indices = @transform_3, window_bounds = array<i64: 256, 384>}, {pipeline_mode = #tpu.pipeline_mode<synchronous>, transform_indices = @transform_4, window_bounds = array<i64: 128, 384>}, {pipeline_mode = #tpu.pipeline_mode<synchronous>, transform_indices = @transform_5, window_bounds = array<i64: 1, 384>}, {pipeline_mode = #tpu.pipeline_mode<synchronous>, transform_indices = @transform_6, window_bounds = array<i64: 1, 384>}, {pipeline_mode = #tpu.pipeline_mode<synchronous>, transform_indices = @transform_7, window_bounds = array<i64: 128, 384>}, {pipeline_mode = #tpu.pipeline_mode<synchronous>, transform_indices = @transform_8, window_bounds = array<i64: 128, 384>}, {pipeline_mode = #tpu.pipeline_mode<synchronous>, transform_indices = @transform_9, window_bounds = array<i64: 1, 384>}, {pipeline_mode = #tpu.pipeline_mode<synchronous>, transform_indices = @transform_10, window_bounds = array<i64: 1, 384>}, {pipeline_mode = #tpu.pipeline_mode<synchronous>, transform_indices = @transform_11, window_bounds = array<i64: 128, 128>}, {pipeline_mode = #tpu.pipeline_mode<synchronous>, transform_indices = @transform_12, window_bounds = array<i64: 1, 128>}, {transform_indices = @transform_13, window_bounds = array<i64: 1, 24, 128>}, {transform_indices = @transform_14, window_bounds = array<i64: 1, 24, 128>}]} {
    %c0 = arith.constant 0 : index
    %c0_0 = arith.constant 0 : index
    %0 = vector.load %arg2[%c0, %c0_0] : memref<24x256xf32, #tpu.memory_space<vmem>>, vector<24x256xf32>
    %1 = vector.extract_strided_slice %0 {offsets = [0, 0], sizes = [24, 128], strides = [1, 1]} : vector<24x256xf32> to vector<24x128xf32>
    %c0_1 = arith.constant 0 : index
    %c0_2 = arith.constant 0 : index
    %c0_3 = arith.constant 0 : index
    %2 = vector.load %arg3[%c0_1, %c0_2, %c0_3] : memref<1x1x128xf32, #tpu.memory_space<vmem>>, vector<1x1x128xf32>
    %3 = vector.shape_cast %2 : vector<1x1x128xf32> to vector<1x128xf32>
    %c0_4 = arith.constant 0 : index
    %c0_5 = arith.constant 0 : index
    %4 = vector.load %arg5[%c0_4, %c0_5] : memref<256x384xf32, #tpu.memory_space<vmem>>, vector<256x384xf32>
    %cst = arith.constant dense<0.000000e+00> : vector<24x384xf32>
    %5 = tpu.matmul %0, %4, %cst {dimension_numbers = #tpu.dot_dimension_numbers<[1], [0], [0], [1], [0, 0, 1, 1], [], []>} : vector<24x256xf32>, vector<256x384xf32>, vector<24x384xf32> -> vector<24x384xf32>
    %c0_6 = arith.constant 0 : index
    %c0_7 = arith.constant 0 : index
    %6 = vector.load %arg7[%c0_6, %c0_7] : memref<1x384xf32, #tpu.memory_space<vmem>>, vector<1x384xf32>
    %7 = vector.broadcast %6 : vector<1x384xf32> to vector<24x384xf32>
    %8 = arith.addf %5, %7 : vector<24x384xf32>
    %c0_8 = arith.constant 0 : index
    %c0_9 = arith.constant 0 : index
    %9 = vector.load %arg6[%c0_8, %c0_9] : memref<128x384xf32, #tpu.memory_space<vmem>>, vector<128x384xf32>
    %cst_10 = arith.constant dense<0.000000e+00> : vector<1x384xf32>
    %10 = tpu.matmul %3, %9, %cst_10 {dimension_numbers = #tpu.dot_dimension_numbers<[1], [0], [0], [1], [0, 0, 1, 1], [], []>} : vector<1x128xf32>, vector<128x384xf32>, vector<1x384xf32> -> vector<1x384xf32>
    %c0_11 = arith.constant 0 : index
    %c0_12 = arith.constant 0 : index
    %11 = vector.load %arg8[%c0_11, %c0_12] : memref<1x384xf32, #tpu.memory_space<vmem>>, vector<1x384xf32>
    %12 = arith.addf %10, %11 : vector<1x384xf32>
    %13 = vector.extract_strided_slice %8 {offsets = [0, 0], sizes = [24, 128], strides = [1, 1]} : vector<24x384xf32> to vector<24x128xf32>
    %14 = vector.extract_strided_slice %12 {offsets = [0, 0], sizes = [1, 128], strides = [1, 1]} : vector<1x384xf32> to vector<1x128xf32>
    %15 = vector.broadcast %14 : vector<1x128xf32> to vector<24x128xf32>
    %16 = arith.addf %13, %15 : vector<24x128xf32>
    %17 = arith.negf %16 : vector<24x128xf32>
    %18 = math.exp %17 : vector<24x128xf32>
    %cst_13 = arith.constant 1.000000e+00 : f32
    %19 = vector.broadcast %cst_13 : f32 to vector<24x128xf32>
    %20 = arith.addf %19, %18 : vector<24x128xf32>
    %21 = arith.divf %19, %20 : vector<24x128xf32>
    %22 = vector.extract_strided_slice %8 {offsets = [0, 128], sizes = [24, 128], strides = [1, 1]} : vector<24x384xf32> to vector<24x128xf32>
    %23 = vector.extract_strided_slice %12 {offsets = [0, 128], sizes = [1, 128], strides = [1, 1]} : vector<1x384xf32> to vector<1x128xf32>
    %24 = vector.broadcast %23 : vector<1x128xf32> to vector<24x128xf32>
    %25 = arith.addf %22, %24 : vector<24x128xf32>
    %26 = arith.negf %25 : vector<24x128xf32>
    %27 = math.exp %26 : vector<24x128xf32>
    %cst_14 = arith.constant 1.000000e+00 : f32
    %28 = vector.broadcast %cst_14 : f32 to vector<24x128xf32>
    %29 = arith.addf %28, %27 : vector<24x128xf32>
    %30 = arith.divf %28, %29 : vector<24x128xf32>
    %31 = vector.extract_strided_slice %8 {offsets = [0, 256], sizes = [24, 128], strides = [1, 1]} : vector<24x384xf32> to vector<24x128xf32>
    %32 = vector.extract_strided_slice %12 {offsets = [0, 256], sizes = [1, 128], strides = [1, 1]} : vector<1x384xf32> to vector<1x128xf32>
    %33 = vector.broadcast %32 : vector<1x128xf32> to vector<24x128xf32>
    %34 = arith.mulf %21, %33 : vector<24x128xf32>
    %35 = arith.addf %31, %34 : vector<24x128xf32>
    %36 = math.tanh %35 : vector<24x128xf32>
    %cst_15 = arith.constant 1.000000e+00 : f32
    %37 = vector.broadcast %cst_15 : f32 to vector<24x128xf32>
    %38 = arith.subf %37, %30 : vector<24x128xf32>
    %39 = arith.mulf %38, %36 : vector<24x128xf32>
    %40 = vector.broadcast %3 : vector<1x128xf32> to vector<24x128xf32>
    %41 = arith.mulf %30, %40 : vector<24x128xf32>
    %42 = arith.addf %39, %41 : vector<24x128xf32>
    %c0_16 = arith.constant 0 : index
    %c0_17 = arith.constant 0 : index
    %c0_18 = arith.constant 0 : index
    %43 = vector.load %arg4[%c0_16, %c0_17, %c0_18] : memref<1x1x128xf32, #tpu.memory_space<vmem>>, vector<1x1x128xf32>
    %44 = vector.shape_cast %43 : vector<1x1x128xf32> to vector<1x128xf32>
    %c0_19 = arith.constant 0 : index
    %c0_20 = arith.constant 0 : index
    %45 = vector.load %arg9[%c0_19, %c0_20] : memref<128x384xf32, #tpu.memory_space<vmem>>, vector<128x384xf32>
    %cst_21 = arith.constant dense<0.000000e+00> : vector<24x384xf32>
    %46 = tpu.matmul %42, %45, %cst_21 {dimension_numbers = #tpu.dot_dimension_numbers<[1], [0], [0], [1], [0, 0, 1, 1], [], []>} : vector<24x128xf32>, vector<128x384xf32>, vector<24x384xf32> -> vector<24x384xf32>
    %c0_22 = arith.constant 0 : index
    %c0_23 = arith.constant 0 : index
    %47 = vector.load %arg11[%c0_22, %c0_23] : memref<1x384xf32, #tpu.memory_space<vmem>>, vector<1x384xf32>
    %48 = vector.broadcast %47 : vector<1x384xf32> to vector<24x384xf32>
    %49 = arith.addf %46, %48 : vector<24x384xf32>
    %c0_24 = arith.constant 0 : index
    %c0_25 = arith.constant 0 : index
    %50 = vector.load %arg10[%c0_24, %c0_25] : memref<128x384xf32, #tpu.memory_space<vmem>>, vector<128x384xf32>
    %cst_26 = arith.constant dense<0.000000e+00> : vector<1x384xf32>
    %51 = tpu.matmul %44, %50, %cst_26 {dimension_numbers = #tpu.dot_dimension_numbers<[1], [0], [0], [1], [0, 0, 1, 1], [], []>} : vector<1x128xf32>, vector<128x384xf32>, vector<1x384xf32> -> vector<1x384xf32>
    %c0_27 = arith.constant 0 : index
    %c0_28 = arith.constant 0 : index
    %52 = vector.load %arg12[%c0_27, %c0_28] : memref<1x384xf32, #tpu.memory_space<vmem>>, vector<1x384xf32>
    %53 = arith.addf %51, %52 : vector<1x384xf32>
    %54 = vector.extract_strided_slice %49 {offsets = [0, 0], sizes = [24, 128], strides = [1, 1]} : vector<24x384xf32> to vector<24x128xf32>
    %55 = vector.extract_strided_slice %53 {offsets = [0, 0], sizes = [1, 128], strides = [1, 1]} : vector<1x384xf32> to vector<1x128xf32>
    %56 = vector.broadcast %55 : vector<1x128xf32> to vector<24x128xf32>
    %57 = arith.addf %54, %56 : vector<24x128xf32>
    %58 = arith.negf %57 : vector<24x128xf32>
    %59 = math.exp %58 : vector<24x128xf32>
    %cst_29 = arith.constant 1.000000e+00 : f32
    %60 = vector.broadcast %cst_29 : f32 to vector<24x128xf32>
    %61 = arith.addf %60, %59 : vector<24x128xf32>
    %62 = arith.divf %60, %61 : vector<24x128xf32>
    %63 = vector.extract_strided_slice %49 {offsets = [0, 128], sizes = [24, 128], strides = [1, 1]} : vector<24x384xf32> to vector<24x128xf32>
    %64 = vector.extract_strided_slice %53 {offsets = [0, 128], sizes = [1, 128], strides = [1, 1]} : vector<1x384xf32> to vector<1x128xf32>
    %65 = vector.broadcast %64 : vector<1x128xf32> to vector<24x128xf32>
    %66 = arith.addf %63, %65 : vector<24x128xf32>
    %67 = arith.negf %66 : vector<24x128xf32>
    %68 = math.exp %67 : vector<24x128xf32>
    %cst_30 = arith.constant 1.000000e+00 : f32
    %69 = vector.broadcast %cst_30 : f32 to vector<24x128xf32>
    %70 = arith.addf %69, %68 : vector<24x128xf32>
    %71 = arith.divf %69, %70 : vector<24x128xf32>
    %72 = vector.extract_strided_slice %49 {offsets = [0, 256], sizes = [24, 128], strides = [1, 1]} : vector<24x384xf32> to vector<24x128xf32>
    %73 = vector.extract_strided_slice %53 {offsets = [0, 256], sizes = [1, 128], strides = [1, 1]} : vector<1x384xf32> to vector<1x128xf32>
    %74 = vector.broadcast %73 : vector<1x128xf32> to vector<24x128xf32>
    %75 = arith.mulf %62, %74 : vector<24x128xf32>
    %76 = arith.addf %72, %75 : vector<24x128xf32>
    %77 = math.tanh %76 : vector<24x128xf32>
    %cst_31 = arith.constant 1.000000e+00 : f32
    %78 = vector.broadcast %cst_31 : f32 to vector<24x128xf32>
    %79 = arith.subf %78, %71 : vector<24x128xf32>
    %80 = arith.mulf %79, %77 : vector<24x128xf32>
    %81 = vector.broadcast %44 : vector<1x128xf32> to vector<24x128xf32>
    %82 = arith.mulf %71, %81 : vector<24x128xf32>
    %83 = arith.addf %80, %82 : vector<24x128xf32>
    %84 = arith.index_cast %arg0 : i32 to index
    %85 = memref.load %arg1[%84] : memref<2xi32, #tpu.memory_space<smem>>
    %86 = tpu.iota {dimensions = array<i32: 0>} : vector<24x1xi32>
    %c8_i32 = arith.constant 8 : i32
    %87 = arith.muli %85, %c8_i32 : i32
    %88 = vector.broadcast %87 : i32 to vector<24x1xi32>
    %89 = arith.cmpi sge, %86, %88 : vector<24x1xi32>
    %c1_i32 = arith.constant 1 : i32
    %90 = arith.addi %85, %c1_i32 : i32
    %c8_i32_32 = arith.constant 8 : i32
    %91 = arith.muli %90, %c8_i32_32 : i32
    %92 = vector.broadcast %91 : i32 to vector<24x1xi32>
    %93 = arith.cmpi slt, %86, %92 : vector<24x1xi32>
    %94 = arith.andi %89, %93 : vector<24x1xi1>
    %95 = vector.shape_cast %94 : vector<24x1xi1> to vector<24x1xi1>
    %96 = vector.broadcast %95 : vector<24x1xi1> to vector<24x128xi1>
    %97 = arith.select %96, %1, %83 : vector<24x128xi1>, vector<24x128xf32>
    %c0_33 = arith.constant 0 : index
    %c0_34 = arith.constant 0 : index
    %c0_35 = arith.constant 0 : index
    %98 = vector.load %arg15[%c0_33, %c0_34, %c0_35] : memref<1x24x128xf32, #tpu.memory_space<vmem>>, vector<1x24x128xf32>
    %99 = vector.shape_cast %98 : vector<1x24x128xf32> to vector<24x128xf32>
    %100 = vector.shape_cast %97 : vector<24x128xf32> to vector<1x24x128xf32>
    tpu.vector_store %arg15[%c0_33, %c0_34, %c0_35], %100 {strides = array<i32>} : memref<1x24x128xf32, #tpu.memory_space<vmem>>, vector<1x24x128xf32>,
    %c0_36 = arith.constant 0 : index
    %c0_37 = arith.constant 0 : index
    %101 = vector.load %arg13[%c0_36, %c0_37] : memref<128x128xf32, #tpu.memory_space<vmem>>, vector<128x128xf32>
    %cst_38 = arith.constant dense<0.000000e+00> : vector<24x128xf32>
    %102 = tpu.matmul %97, %101, %cst_38 {dimension_numbers = #tpu.dot_dimension_numbers<[1], [0], [0], [1], [0, 0, 1, 1], [], []>} : vector<24x128xf32>, vector<128x128xf32>, vector<24x128xf32> -> vector<24x128xf32>
    %c0_39 = arith.constant 0 : index
    %c0_40 = arith.constant 0 : index
    %103 = vector.load %arg14[%c0_39, %c0_40] : memref<1x128xf32, #tpu.memory_space<vmem>>, vector<1x128xf32>
    %104 = vector.broadcast %103 : vector<1x128xf32> to vector<24x128xf32>
    %105 = arith.addf %102, %104 : vector<24x128xf32>
    %c0_41 = arith.constant 0 : index
    %c0_42 = arith.constant 0 : index
    %c0_43 = arith.constant 0 : index
    %106 = vector.load %arg16[%c0_41, %c0_42, %c0_43] : memref<1x24x128xf32, #tpu.memory_space<vmem>>, vector<1x24x128xf32>
    %107 = vector.shape_cast %106 : vector<1x24x128xf32> to vector<24x128xf32>
    %108 = vector.shape_cast %105 : vector<24x128xf32> to vector<1x24x128xf32>
    tpu.vector_store %arg16[%c0_41, %c0_42, %c0_43], %108 {strides = array<i32>} : memref<1x24x128xf32, #tpu.memory_space<vmem>>, vector<1x24x128xf32>,
    return
  }
  func.func @transform_0(%arg0: i32, %arg1: memref<2xi32, #tpu.memory_space<smem>>) -> (i32, i32) {
    %c0_i32 = arith.constant 0 : i32
    %c0_i32_0 = arith.constant 0 : i32
    %c0_i32_1 = arith.constant 0 : i32
    return %c0_i32, %c0_i32_0 : i32, i32
  }
  func.func @transform_1(%arg0: i32, %arg1: memref<2xi32, #tpu.memory_space<smem>>) -> (i32, i32, i32) {
    %c0_i32 = arith.constant 0 : i32
    %c0_i32_0 = arith.constant 0 : i32
    %c0_i32_1 = arith.constant 0 : i32
    return %arg0, %c0_i32, %c0_i32_0 : i32, i32, i32
  }
  func.func @transform_2(%arg0: i32, %arg1: memref<2xi32, #tpu.memory_space<smem>>) -> (i32, i32, i32) {
    %c0_i32 = arith.constant 0 : i32
    %c0_i32_0 = arith.constant 0 : i32
    %c0_i32_1 = arith.constant 0 : i32
    return %arg0, %c0_i32, %c0_i32_0 : i32, i32, i32
  }
  func.func @transform_3(%arg0: i32, %arg1: memref<2xi32, #tpu.memory_space<smem>>) -> (i32, i32) {
    %c0_i32 = arith.constant 0 : i32
    %c0_i32_0 = arith.constant 0 : i32
    %c0_i32_1 = arith.constant 0 : i32
    return %c0_i32, %c0_i32_0 : i32, i32
  }
  func.func @transform_4(%arg0: i32, %arg1: memref<2xi32, #tpu.memory_space<smem>>) -> (i32, i32) {
    %c0_i32 = arith.constant 0 : i32
    %c0_i32_0 = arith.constant 0 : i32
    %c0_i32_1 = arith.constant 0 : i32
    return %c0_i32, %c0_i32_0 : i32, i32
  }
  func.func @transform_5(%arg0: i32, %arg1: memref<2xi32, #tpu.memory_space<smem>>) -> (i32, i32) {
    %c0_i32 = arith.constant 0 : i32
    %c0_i32_0 = arith.constant 0 : i32
    %c0_i32_1 = arith.constant 0 : i32
    return %c0_i32, %c0_i32_0 : i32, i32
  }
  func.func @transform_6(%arg0: i32, %arg1: memref<2xi32, #tpu.memory_space<smem>>) -> (i32, i32) {
    %c0_i32 = arith.constant 0 : i32
    %c0_i32_0 = arith.constant 0 : i32
    %c0_i32_1 = arith.constant 0 : i32
    return %c0_i32, %c0_i32_0 : i32, i32
  }
  func.func @transform_7(%arg0: i32, %arg1: memref<2xi32, #tpu.memory_space<smem>>) -> (i32, i32) {
    %c0_i32 = arith.constant 0 : i32
    %c0_i32_0 = arith.constant 0 : i32
    %c0_i32_1 = arith.constant 0 : i32
    return %c0_i32, %c0_i32_0 : i32, i32
  }
  func.func @transform_8(%arg0: i32, %arg1: memref<2xi32, #tpu.memory_space<smem>>) -> (i32, i32) {
    %c0_i32 = arith.constant 0 : i32
    %c0_i32_0 = arith.constant 0 : i32
    %c0_i32_1 = arith.constant 0 : i32
    return %c0_i32, %c0_i32_0 : i32, i32
  }
  func.func @transform_9(%arg0: i32, %arg1: memref<2xi32, #tpu.memory_space<smem>>) -> (i32, i32) {
    %c0_i32 = arith.constant 0 : i32
    %c0_i32_0 = arith.constant 0 : i32
    %c0_i32_1 = arith.constant 0 : i32
    return %c0_i32, %c0_i32_0 : i32, i32
  }
  func.func @transform_10(%arg0: i32, %arg1: memref<2xi32, #tpu.memory_space<smem>>) -> (i32, i32) {
    %c0_i32 = arith.constant 0 : i32
    %c0_i32_0 = arith.constant 0 : i32
    %c0_i32_1 = arith.constant 0 : i32
    return %c0_i32, %c0_i32_0 : i32, i32
  }
  func.func @transform_11(%arg0: i32, %arg1: memref<2xi32, #tpu.memory_space<smem>>) -> (i32, i32) {
    %c0_i32 = arith.constant 0 : i32
    %c0_i32_0 = arith.constant 0 : i32
    %c0_i32_1 = arith.constant 0 : i32
    return %c0_i32, %c0_i32_0 : i32, i32
  }
  func.func @transform_12(%arg0: i32, %arg1: memref<2xi32, #tpu.memory_space<smem>>) -> (i32, i32) {
    %c0_i32 = arith.constant 0 : i32
    %c0_i32_0 = arith.constant 0 : i32
    %c0_i32_1 = arith.constant 0 : i32
    return %c0_i32, %c0_i32_0 : i32, i32
  }
  func.func @transform_13(%arg0: i32, %arg1: memref<2xi32, #tpu.memory_space<smem>>) -> (i32, i32, i32) {
    %c0_i32 = arith.constant 0 : i32
    %c0_i32_0 = arith.constant 0 : i32
    %c0_i32_1 = arith.constant 0 : i32
    return %arg0, %c0_i32, %c0_i32_0 : i32, i32, i32
  }
  func.func @transform_14(%arg0: i32, %arg1: memref<2xi32, #tpu.memory_space<smem>>) -> (i32, i32, i32) {
    %c0_i32 = arith.constant 0 : i32
    %c0_i32_0 = arith.constant 0 : i32
    %c0_i32_1 = arith.constant 0 : i32
    return %arg0, %c0_i32, %c0_i32_0 : i32, i32, i32
  }
}

</mosaic_0001>

<bundles_post_ra>
// kernel: forward.2
= control target key start
LH: loop header
LB: loop body
LE: loop exit
PB: predicated region body
PF: predicated region fallthrough
CT: control target
= control target key end

     0   :  { %v263_v59 = vmov 0   ;;  %v152_v60 = vlaneseq  ;;  %vm156_vm1 = vcmask 7168   ;;  %s410_s1 = inlined_call_operand.vmem [shape: f32[256,128], index: 1, kind: input, shape index: {}]   ;;  %s411_s0 = inlined_call_operand.vmem [shape: f32[8,256], index: 0, kind: input, shape index: {}]   ;;  %s412_s4 = inlined_call_operand.<no memory space> [shape: f32[1,1], index: 4, kind: input, shape index: {}]   ;;  %s413_s2 = inlined_call_operand.vmem [shape: f32[1,128], index: 2, kind: input, shape index: {}]   ;;  %s414_s3 = inlined_call_operand.vmem [shape: f32[1,128], index: 3, kind: input, shape index: {}]   ;;  %s415_s5 = inlined_call_operand.vmem [shape: f32[8,128], index: 5, kind: output, shape index: {}]  }
   0x1   :  { %v40_v0 = vld [vmem:[%s410_s1 + $0x80] sm:$0xff]  ;;  %v41_v1 = vld [vmem:[%s410_s1 + $0x88] sm:$0xff]  ;;  %v42_v5 = vld [vmem:[%s410_s1 + $0x90] sm:$0xff]  ;;  %v10_v50 = vstv %s412_s4  ;;  %258 = vset.pattern.permute.xlu0 %v263_v59 }
   0x2   :  { %v24_v2 = vld [vmem:[%s410_s1] sm:$0xff]  ;;  %v225_v3 = vpack.c.bf16 %v41_v1, %v40_v0  ;;  %v25_v4 = vld [vmem:[%s410_s1 + $0x8] sm:$0xff]  ;;  %v43_v6 = vld [vmem:[%s410_s1 + $0x98] sm:$0xff]  ;;  %11 = vst [vmem:[#allocation2] sm:$0x1] %v10_v50  ;;  %v153_v61 = vshrl.u32 %v152_v60, 7 }
   0x3   :  { %v227_v7 = vpack.c.bf16 %v25_v4, %v24_v2  ;;  %v229_v8 = vpack.c.bf16 %v43_v6, %v42_v5  ;;  %v26_v9 = vld [vmem:[%s410_s1 + $0x10] sm:$0xff]  ;;  %v27_v10 = vld [vmem:[%s410_s1 + $0x18] sm:$0xff]  ;;  %v44_v11 = vld [vmem:[%s410_s1 + $0xa0] sm:$0xff] }
   0x4   :  { %226 = vmatprep.subr.bf16.mxu0 %v225_v3  ;;  %v45_v12 = vld [vmem:[%s410_s1 + $0xa8] sm:$0xff]  ;;  %v231_v13 = vpack.c.bf16 %v27_v10, %v26_v9  ;;  %v28_v15 = vld [vmem:[%s410_s1 + $0x20] sm:$0xff]  ;;  %v46_v17 = vld [vmem:[%s410_s1 + $0xb0] sm:$0xff]  ;;  %vm154_vm0 = vcmp.lt.s32.totalorder %v153_v61, 3 }
   0x5   :  { %228 = vmatpush3.bf16.msra.mxu0 %v227_v7  ;;  %v233_v14 = vpack.c.bf16 %v45_v12, %v44_v11  ;;  %v29_v16 = vld [vmem:[%s410_s1 + $0x28] sm:$0xff]  ;;  %v47_v18 = vld [vmem:[%s410_s1 + $0xb8] sm:$0xff]  ;;  %v30_v21 = vld [vmem:[%s410_s1 + $0x30] sm:$0xff] }
   0x6   :  { %230 = vmatprep.subr.bf16.mxu0 %v229_v8  ;;  %v235_v19 = vpack.c.bf16 %v29_v16, %v28_v15  ;;  %v237_v20 = vpack.c.bf16 %v47_v18, %v46_v17  ;;  %v31_v22 = vld [vmem:[%s410_s1 + $0x38] sm:$0xff]  ;;  %v48_v23 = vld [vmem:[%s410_s1 + $0xc0] sm:$0xff]  ;;  %v49_v24 = vld [vmem:[%s410_s1 + $0xc8] sm:$0xff] }
   0x7   :  { %v23_v25 = vld [vmem:[%s411_s0 + $0x8] sm:$0xff]  ;;  %v239_v26 = vpack.c.bf16 %v31_v22, %v30_v21  ;;  %v241_v27 = vpack.c.bf16 %v49_v24, %v48_v23  ;;  %v32_v28 = vld [vmem:[%s410_s1 + $0x40] sm:$0xff]  ;;  %v50_v30 = vld [vmem:[%s410_s1 + $0xd0] sm:$0xff] }
   0x8   :  { %127 = vmatprep.mubr.f32.mxu0 %v23_v25  ;;  %v33_v29 = vld [vmem:[%s410_s1 + $0x48] sm:$0xff]  ;;  %v51_v31 = vld [vmem:[%s410_s1 + $0xd8] sm:$0xff]  ;;  %v34_v34 = vld [vmem:[%s410_s1 + $0x50] sm:$0xff] }
   0x9   :  { %232 = vmatpush3.bf16.msra.mxu0 %v231_v13  ;;  %v243_v32 = vpack.c.bf16 %v33_v29, %v32_v28  ;;  %v245_v33 = vpack.c.bf16 %v51_v31, %v50_v30  ;;  %v35_v35 = vld [vmem:[%s410_s1 + $0x58] sm:$0xff]  ;;  %v52_v36 = vld [vmem:[%s410_s1 + $0xe0] sm:$0xff]  ;;  %v53_v37 = vld [vmem:[%s410_s1 + $0xe8] sm:$0xff] }
   0xa   :  { %234 = vmatprep.subr.bf16.mxu0 %v233_v14  ;;  %v247_v38 = vpack.c.bf16 %v35_v35, %v34_v34  ;;  %v249_v39 = vpack.c.bf16 %v53_v37, %v52_v36  ;;  %v36_v40 = vld [vmem:[%s410_s1 + $0x60] sm:$0xff]  ;;  %v37_v41 = vld [vmem:[%s410_s1 + $0x68] sm:$0xff]  ;;  %v54_v42 = vld [vmem:[%s410_s1 + $0xf0] sm:$0xff] }
   0xb   :  { %v55_v43 = vld [vmem:[%s410_s1 + $0xf8] sm:$0xff]  ;;  %v251_v44 = vpack.c.bf16 %v37_v41, %v36_v40  ;;  %v38_v46 = vld [vmem:[%s410_s1 + $0x70] sm:$0xff]  ;;  %v22_v49 = vld [vmem:[%s411_s0] sm:$0xff] }
   0xc   :  { %v253_v45 = vpack.c.bf16 %v55_v43, %v54_v42  ;;  %v39_v47 = vld [vmem:[%s410_s1 + $0x78] sm:$0xff]  ;;  %v187_v53 = vld [vmem:[%s413_s2] ss:$0 sm:$0xff] }
   0xd   :  { %236 = vmatpush3.bf16.msra.mxu0 %v235_v19  ;;  %v255_v48 = vpack.c.bf16 %v39_v47, %v38_v46  ;;  %v188_v56 = vld [vmem:[%s414_s3] ss:$0 sm:$0xff] }
   0xe   :  { %238 = vmatprep.subr.bf16.mxu0 %v237_v20  ;;  %v189_v62 = vld [vmem:[#allocation2] ss:$0 sm:$0xff] }
  0x11   :  { %240 = vmatpush3.bf16.msra.mxu0 %v239_v26 }
  0x12   :  { %242 = vmatprep.subr.bf16.mxu0 %v241_v27 }
  0x15   :  { %244 = vmatpush3.bf16.msra.mxu0 %v243_v32 }
  0x16   :  { %246 = vmatprep.subr.bf16.mxu0 %v245_v33 }
  0x19   :  { %248 = vmatpush3.bf16.msra.mxu0 %v247_v38 }
  0x1a   :  { %250 = vmatprep.subr.bf16.mxu0 %v249_v39 }
  0x1d   :  { %252 = vmatpush3.bf16.msra.mxu0 %v251_v44 }
  0x1e   :  { %254 = vmatprep.subr.bf16.mxu0 %v253_v45 }
  0x21   :  { %256 = vmatpush3.bf16.msra.mxu0 %v255_v48 }
  0x24   :  { %128 = vmatmul.mubr.f32.vlgmr.msra.gmra.mrb[0].mxu0 %v22_v49 }
  0xf7   :  { %v222_v51 = vpop.f32.mrb[0].mxu0 }
  0xf8   :  { %v223_v52 = vpop.f32.mrb[1].mxu0 }
  0xf9   :  { %v224_v54 = vadd.f32 %v223_v52, %v222_v51 }
  0xfb   :  { %v130_v55 = vadd.f32 %v224_v54, %v187_v53 }
  0xfd   :  { %v133_v57 = vmax.f32 %v130_v55, 0.0 }
  0xff   :  { %v141_v58 = vmul.f32 %v188_v56, %v133_v57 }
 0x101   :  { %142 = vadd.xlane.f32.xlu0 %v141_v58 }
 0x18e   :  { %v143_v63 = vpop.xlane.xlu0 %142 }
 0x18f   :  { %v151_v0 = vadd.f32 %v189_v62, %v143_v63 }
 0x191   :  { %v155_v1 = vsel %vm154_vm0, %v151_v0, -inf }
 0x192   :  { %v157_v2 = vsel %vm156_vm1, %v155_v1, -inf }
 0x193   :  { %v158_v3 = vrot.slane %v157_v2, 4 }
 0x195   :  { %v159_v4 = vmax.f32 %v157_v2, %v158_v3 }
 0x197   :  { %v160_v5 = vrot.slane %v159_v4, 2 }
 0x199   :  { %v161_v6 = vmax.f32 %v159_v4, %v160_v5 }
 0x19b   :  { %v162_v7 = vrot.slane %v161_v6, 1 }
 0x19d   :  { %v163_v8 = vmax.f32 %v161_v6, %v162_v7 }
 0x19f   :  { %v164_v9 = vsub.f32 %v155_v1, %v163_v8 }
 0x1a1   :  { %v165_v10 = vmul.f32 1.442695, %v164_v9 }
 0x1a3   :  { %259 = vpow2.f32 %v165_v10 }
 0x1ad   :  { %v260_v11 = vpop.eup %259 }
 0x1ae   :  { %v167_v12 = vsel %vm154_vm0, %v260_v11, 0.0 }
 0x1af   :  { %v168_v13 = vsel %vm156_vm1, %v167_v12, 0.0 }
 0x1b0   :  { %v169_v14 = vrot.slane %v168_v13, 4 }
 0x1b2   :  { %v170_v15 = vadd.f32 %v169_v14, %v168_v13 }
 0x1b4   :  { %v171_v16 = vrot.slane %v170_v15, 2 }
 0x1b6   :  { %v172_v17 = vadd.f32 %v171_v16, %v170_v15 }
 0x1b8   :  { %v173_v18 = vrot.slane %v172_v17, 1 }
 0x1ba   :  { %v174_v19 = vadd.f32 %v173_v18, %v172_v17 }
 0x1bc   :  { %261 = vrcp.f32 %v174_v19 }
 0x1c6   :  { %v262_v20 = vpop.eup %261 }
 0x1c7   :  { %v176_v21 = vmul.f32 %v262_v20, %v167_v12 }
 0x1c9   :  { %179 = vperm.xlu0 %258, %v176_v21  }
 0x248   :  { %v180_v22 = vpop.permute.xlu0 %179 }
 0x249   :  { %182 = vst [vmem:[%s415_s5] sm:$0xff] %v180_v22 }

// kernel: forward.3
= control target key start
LH: loop header
LB: loop body
LE: loop exit
PB: predicated region body
PF: predicated region fallthrough
CT: control target
= control target key end

     0   :  { %s3858_s0 = inlined_call_operand.vmem [shape: s32[2], index: 0, kind: input, shape index: {}]   ;;  %s3859_s1 = inlined_call_operand.vmem [shape: f32[24,256], index: 1, kind: input, shape index: {}]   ;;  %s3860_s2 = inlined_call_operand.vmem [shape: f32[2,1,128], index: 2, kind: input, shape index: {}]   ;;  %s3861_s3 = inlined_call_operand.vmem [shape: f32[2,1,128], index: 3, kind: input, shape index: {}]   ;;  %s3862_s4 = inlined_call_operand.vmem [shape: f32[256,384], index: 4, kind: input, shape index: {}]   ;;  %s3863_s5 = inlined_call_operand.vmem [shape: f32[128,384], index: 5, kind: input, shape index: {}]   ;;  %s3864_s6 = inlined_call_operand.vmem [shape: f32[1,384], index: 6, kind: input, shape index: {}]   ;;  %s3865_s7 = inlined_call_operand.vmem [shape: f32[1,384], index: 7, kind: input, shape index: {}]   ;;  %s3866_s8 = inlined_call_operand.vmem [shape: f32[128,384], index: 8, kind: input, shape index: {}]   ;;  %s3867_s9 = inlined_call_operand.vmem [shape: f32[128,384], index: 9, kind: input, shape index: {}]   ;;  %s3868_s10 = inlined_call_operand.vmem [shape: f32[1,384], index: 10, kind: input, shape index: {}]   ;;  %s3869_s11 = inlined_call_operand.vmem [shape: f32[1,384], index: 11, kind: input, shape index: {}]   ;;  %s3870_s12 = inlined_call_operand.vmem [shape: f32[128,128], index: 12, kind: input, shape index: {}]   ;;  %s3871_s13 = inlined_call_operand.vmem [shape: f32[1,128], index: 13, kind: input, shape index: {}]   ;;  %s3872_s14 = inlined_call_operand.hbm [shape: f32[2,24,128], index: 14, kind: output, shape index: {0}]   ;;  %s3873_s15 = inlined_call_operand.hbm [shape: f32[2,24,128], index: 15, kind: output, shape index: {1}]  }
   0x1   :  { %s21_s20 = sshll.u32 %s3858_s0, 4  ;;  %s22_s20 = int_to_ptr.vmem [resolvable:$true] %s21_s20 }
   0x2   :  { %s2544_s21 = scalar_lea.vmem %s22_s20, 16  ;;  %p2549_p1 = scmp.lt.s32.totalorder %s22_s20, %s22_s20 }
   0x3   :  { %p2545_p0 = scmp.ne.s32.totalorder %s22_s20, %s2544_s21  ;;  %p2550_p2 = scmp.lt.s32.totalorder %s2544_s21, %s2544_s21 }
   0x5   :  { %p2551_p3 = por %p2550_p2, %p2549_p1 }
   0x7   :  { %p2552_p4 = pnand %p2551_p3, %p2545_p0 }
   0x9   :  { %2555 = shalt.err (!%p2552_p4)  }
   0xa   :  { %s2654_s22 = smov [#allocation3]  }
   0xb   :  { %24 = dma.vmem_to_smem %s22_s20, 16, %s2654_s22, [#allocation2] }
   0xc   :  { %2628 = dma.done.wait [#allocation2], 16 }
   0xd   :  { %2629 = vsyncadd [#allocation2], 4294967280 }
   0xe   :  { %26 = sfence }
   0xf   :  { %27 = vsyncpa [#allocation5], 0 }
  0x10   :  { %29 = vsyncpa [#allocation5 + $0x1], 0 }
  0x11   :  { %30 = vsyncpa [#allocation7], 0 }
  0x12   :  { %32 = vsyncpa [#allocation7 + $0x1], 0  ;;  %s2745_s23 = smov 0   ;;  %s2747_s0 = smov 0  }
  0x13   :  { %s2749_s24 = smov 0   ;;  %s2751_s25 = smov 0  }
  0x14 LB: > { %3883 = sst [smem:[#allocation11_spill]] %s2640_s23  ;;  %s2766_s26 = sadd.s32 4294967295, %s2652_s25   ;;  %s2652_s25 = sphi %s2751_s25, %s3896_s25   ;;  %s2648_s24 = sphi %s2749_s24, %s3898_s24   ;;  %s2644_s0 = sphi %s2747_s0, %s3900_s0   ;;  %s2640_s23 = sphi %s2745_s23, %s3899_s23  }
  0x15   : > { %3884 = sst [smem:[#allocation12_spill]] %s2648_s24  ;;  %s1850_s27 = sadd.s32 4294967294, %s2652_s25  }
  0x16   : > { %s2770_s28 = sadd.s32 1, %s2652_s25   ;;  %s328_s29 = sadd.s32 1, %s2648_s24 }
  0x17   : > { %3885 = sst [smem:[#allocation13_spill]] %s2770_s28  ;;  %s325_s30 = ssub.s32 %s2652_s25, %s2770_s28 }
  0x18   : > { %p338_p5 = scmp.ne.s32.totalorder %s2648_s24, %s2644_s0  ;;  %p326_p6 = scmp.eq.s32.totalorder %s325_s30, 0 }
  0x19   : > { %p339_p7 = scmp.eq.s32.totalorder %s2766_s26, 1  ;;  %p344_p8 = scmp.ne.s32.totalorder %s2644_s0, %s2640_s23 }
  0x1a   : > { %p345_p9 = scmp.eq.s32.totalorder %s1850_s27, 1  ;;  %p1853_p12 = scmp.ge.s32.totalorder %s2652_s25, 1 }
  0x1b   : > { %s2781_s16 = scalar_select %p326_p6, %s2648_s24, %s328_s29  }
  0x1c   : > { %p2783_p10 = por %p339_p7, %p338_p5  ;;  %p2787_p11 = por %p345_p9, %p344_p8 }
  0x1d   : > { %3886 = sst [smem:[#allocation14_spill]] %s2781_s16  ;;  %p434_p13 = scmp.lt.s32.totalorder %s2652_s25, 3 }
  0x1e   : > { %s3888_s18 = scalar_select %p2787_p11, 1, 0 }
  0x1f   : > { %p435_p0 = pnand %p1853_p12, %p434_p13 }
  0x20   : > { %3889 = sst [smem:[#allocation15_spill]] %s3888_s18  ;;  %v500_v0 = vld [vmem:[%s3862_s4 + $0x8] sm:$0xff] (!%p435_p0)  ;;  %v503_v1 = vld [vmem:[%s3862_s4 + $0x20] sm:$0xff] (!%p435_p0)  ;;  %v549_v2 = vld [vmem:[%s3862_s4 + $0x190] sm:$0xff] (!%p435_p0)  ;;  %p486_p1 = scmp.lt.s32.totalorder (!%p435_p0), %s2766_s26, 1  ;;  %vm2657_vm0 = vmmov (!%p435_p0), 0  }
  0x21   : > { %438 = sbr.rel (%p435_p0) target bundleno = 899 (0x383), region = 72  ;;  %v2140_v3 = vpack.c.bf16 (!%p435_p0), %v503_v1, %v500_v0  ;;  %v552_v4 = vld [vmem:[%s3862_s4 + $0x1a8] sm:$0xff] (!%p435_p0)  ;;  %v499_v5 = vld [vmem:[%s3862_s4] sm:$0xff] (!%p435_p0)  ;;  %v502_v6 = vld [vmem:[%s3862_s4 + $0x18] sm:$0xff] (!%p435_p0)  ;;  %s3738_s22 = sand.u32 (!%p435_p0), 1, %s2644_s0  }
  0x22   : > { %v2204_v7 = vpack.c.bf16 (!%p435_p0), %v552_v4, %v549_v2  ;;  %v2142_v8 = vpack.c.bf16 (!%p435_p0), %v502_v6, %v499_v5  ;;  %v501_v9 = vld [vmem:[%s3862_s4 + $0x10] sm:$0xff] (!%p435_p0)  ;;  %v504_v10 = vld [vmem:[%s3862_s4 + $0x28] sm:$0xff] (!%p435_p0)  ;;  %v506_v11 = vld [vmem:[%s3862_s4 + $0x38] sm:$0xff] (!%p435_p0)  ;;  %s1716_s28 = scalar_lea.sflag (!%p435_p0), [#allocation5], %s3738_s22  ;;  %s2658_s23 = smov (!%p435_p0), [#allocation4]  }
  0x23   : > { %2141 = vmatprep.subr.bf16.mxu0 (!%p435_p0), %v2140_v3  ;;  %v2206_v12 = vpack.c.bf16 (!%p435_p0), %v504_v10, %v501_v9  ;;  %v509_v13 = vld [vmem:[%s3862_s4 + $0x50] sm:$0xff] (!%p435_p0)  ;;  %v555_v14 = vld [vmem:[%s3862_s4 + $0x1c0] sm:$0xff] (!%p435_p0)  ;;  %v558_v15 = vld [vmem:[%s3862_s4 + $0x1d8] sm:$0xff] (!%p435_p0) }
  0x24   : > { %2205 = vmatprep.subr.bf16.mxu1 (!%p435_p0), %v2204_v7  ;;  %2143 = vmatpush1.bf16.msra.mxu0 (!%p435_p0), %v2142_v8  ;;  %v2144_v16 = vpack.c.bf16 (!%p435_p0), %v509_v13, %v506_v11  ;;  %v2208_v17 = vpack.c.bf16 (!%p435_p0), %v558_v15, %v555_v14  ;;  %v505_v18 = vld [vmem:[%s3862_s4 + $0x30] sm:$0xff] (!%p435_p0)  ;;  %v508_v19 = vld [vmem:[%s3862_s4 + $0x48] sm:$0xff] (!%p435_p0)  ;;  %v507_v20 = vld [vmem:[%s3862_s4 + $0x40] sm:$0xff] (!%p435_p0) }
  0x25   : > { %2207 = vmatpush3.bf16.msra.mxu1 (!%p435_p0), %v2206_v12  ;;  %v2146_v21 = vpack.c.bf16 (!%p435_p0), %v508_v19, %v505_v18  ;;  %v510_v22 = vld [vmem:[%s3862_s4 + $0x58] sm:$0xff] (!%p435_p0)  ;;  %v512_v23 = vld [vmem:[%s3862_s4 + $0x68] sm:$0xff] (!%p435_p0)  ;;  %v515_v24 = vld [vmem:[%s3862_s4 + $0x80] sm:$0xff] (!%p435_p0) }
  0x26   : > { %2145 = vmatprep.subr.bf16.mxu0 (!%p435_p0), %v2144_v16  ;;  %2209 = vmatprep.subr.bf16.mxu1 (!%p435_p0), %v2208_v17  ;;  %v2210_v25 = vpack.c.bf16 (!%p435_p0), %v510_v22, %v507_v20  ;;  %v2148_v26 = vpack.c.bf16 (!%p435_p0), %v515_v24, %v512_v23  ;;  %v561_v27 = vld [vmem:[%s3862_s4 + $0x1f0] sm:$0xff] (!%p435_p0)  ;;  %v564_v28 = vld [vmem:[%s3862_s4 + $0x208] sm:$0xff] (!%p435_p0)  ;;  %v511_v29 = vld [vmem:[%s3862_s4 + $0x60] sm:$0xff] (!%p435_p0) }
  0x27   : > { %v2212_v30 = vpack.c.bf16 (!%p435_p0), %v564_v28, %v561_v27  ;;  %v514_v31 = vld [vmem:[%s3862_s4 + $0x78] sm:$0xff] (!%p435_p0)  ;;  %v513_v32 = vld [vmem:[%s3862_s4 + $0x70] sm:$0xff] (!%p435_p0)  ;;  %v516_v33 = vld [vmem:[%s3862_s4 + $0x88] sm:$0xff] (!%p435_p0) }
  0x28   : > { %2147 = vmatpush1.bf16.msra.mxu0 %v2146_v21  ;;  %v2150_v34 = vpack.c.bf16 %v514_v31, %v511_v29  ;;  %v518_v35 = vld [vmem:[%s3862_s4 + $0x98] sm:$0xff]  ;;  %v521_v36 = vld [vmem:[%s3862_s4 + $0xb0] sm:$0xff]  ;;  %v567_v37 = vld [vmem:[%s3862_s4 + $0x220] sm:$0xff]  ;;  %v2214_v38 = vpack.c.bf16 %v516_v33, %v513_v32  ;;  %s3215_s18 = scalar_select %p486_p1, %s2766_s26, 1 }
  0x29   : > { %2211 = vmatpush3.bf16.msra.mxu1 %v2210_v25  ;;  %2149 = vmatprep.subr.bf16.mxu0 %v2148_v26  ;;  %v2152_v39 = vpack.c.bf16 %v521_v36, %v518_v35  ;;  %v570_v40 = vld [vmem:[%s3862_s4 + $0x238] sm:$0xff]  ;;  %v517_v41 = vld [vmem:[%s3862_s4 + $0x90] sm:$0xff]  ;;  %v520_v42 = vld [vmem:[%s3862_s4 + $0xa8] sm:$0xff] }
  0x2a   : > { %2213 = vmatprep.subr.bf16.mxu1 %v2212_v30  ;;  %v2216_v43 = vpack.c.bf16 %v570_v40, %v567_v37  ;;  %v519_v44 = vld [vmem:[%s3862_s4 + $0xa0] sm:$0xff]  ;;  %v522_v45 = vld [vmem:[%s3862_s4 + $0xb8] sm:$0xff]  ;;  %v524_v46 = vld [vmem:[%s3862_s4 + $0xc8] sm:$0xff]  ;;  %v2154_v50 = vpack.c.bf16 %v520_v42, %v517_v41  ;;  %s488_s27 = scalar_lea.vmem %s3860_s2, %s3215_s18  ;;  %s491_s24 = scalar_lea.vmem %s3861_s3, %s3215_s18 }
  0x2b   : > { %v527_v47 = vld [vmem:[%s3862_s4 + $0xe0] sm:$0xff]  ;;  %v573_v48 = vld [vmem:[%s3862_s4 + $0x250] sm:$0xff]  ;;  %v576_v49 = vld [vmem:[%s3862_s4 + $0x268] sm:$0xff]  ;;  %v2218_v51 = vpack.c.bf16 %v522_v45, %v519_v44  ;;  %s1578_s18 = sld [smem:[#allocation3 + %s2766_s26]] }
  0x2c   : > { %2151 = vmatpush1.bf16.msra.mxu0 %v2150_v34  ;;  %v2156_v52 = vpack.c.bf16 %v527_v47, %v524_v46  ;;  %v523_v53 = vld [vmem:[%s3862_s4 + $0xc0] sm:$0xff]  ;;  %v526_v54 = vld [vmem:[%s3862_s4 + $0xd8] sm:$0xff]  ;;  %v525_v55 = vld [vmem:[%s3862_s4 + $0xd0] sm:$0xff]  ;;  %v2220_v56 = vpack.c.bf16 %v576_v49, %v573_v48 }
  0x2d   : > { %2215 = vmatpush3.bf16.msra.mxu1 %v2214_v38  ;;  %2153 = vmatprep.subr.bf16.mxu0 %v2152_v39  ;;  %v528_v57 = vld [vmem:[%s3862_s4 + $0xe8] sm:$0xff]  ;;  %v530_v58 = vld [vmem:[%s3862_s4 + $0xf8] sm:$0xff]  ;;  %v533_v59 = vld [vmem:[%s3862_s4 + $0x110] sm:$0xff]  ;;  %v2158_v62 = vpack.c.bf16 %v526_v54, %v523_v53 }
  0x2e   : > { %2217 = vmatprep.subr.bf16.mxu1 %v2216_v43  ;;  %v579_v60 = vld [vmem:[%s3862_s4 + $0x280] sm:$0xff]  ;;  %v582_v61 = vld [vmem:[%s3862_s4 + $0x298] sm:$0xff]  ;;  %v2222_v63 = vpack.c.bf16 %v528_v57, %v525_v55  ;;  %v2160_v0 = vpack.c.bf16 %v533_v59, %v530_v58  ;;  %v529_v1 = vld [vmem:[%s3862_s4 + $0xf0] sm:$0xff] }
  0x2f   : > { %v532_v2 = vld [vmem:[%s3862_s4 + $0x108] sm:$0xff]  ;;  %v531_v3 = vld [vmem:[%s3862_s4 + $0x100] sm:$0xff]  ;;  %v2224_v4 = vpack.c.bf16 %v582_v61, %v579_v60  ;;  %v534_v5 = vld [vmem:[%s3862_s4 + $0x118] sm:$0xff] }
  0x30   : > { %2155 = vmatpush1.bf16.msra.mxu0 %v2154_v50  ;;  %v536_v6 = vld [vmem:[%s3862_s4 + $0x128] sm:$0xff]  ;;  %v539_v7 = vld [vmem:[%s3862_s4 + $0x140] sm:$0xff]  ;;  %v585_v8 = vld [vmem:[%s3862_s4 + $0x2b0] sm:$0xff]  ;;  %v2162_v10 = vpack.c.bf16 %v532_v2, %v529_v1  ;;  %v2226_v12 = vpack.c.bf16 %v534_v5, %v531_v3 }
  0x31   : > { %2219 = vmatpush3.bf16.msra.mxu1 %v2218_v51  ;;  %2157 = vmatprep.subr.bf16.mxu0 %v2156_v52  ;;  %v588_v9 = vld [vmem:[%s3862_s4 + $0x2c8] sm:$0xff]  ;;  %v535_v11 = vld [vmem:[%s3862_s4 + $0x120] sm:$0xff]  ;;  %v2164_v13 = vpack.c.bf16 %v539_v7, %v536_v6  ;;  %v538_v14 = vld [vmem:[%s3862_s4 + $0x138] sm:$0xff]  ;;  %s1866_s20 = sshll.u32 %s1578_s18, 3 }
  0x32   : > { %2221 = vmatprep.subr.bf16.mxu1 %v2220_v56  ;;  %v537_v15 = vld [vmem:[%s3862_s4 + $0x130] sm:$0xff]  ;;  %v540_v16 = vld [vmem:[%s3862_s4 + $0x148] sm:$0xff]  ;;  %v2228_v17 = vpack.c.bf16 %v588_v9, %v585_v8  ;;  %v542_v18 = vld [vmem:[%s3862_s4 + $0x158] sm:$0xff]  ;;  %v2166_v23 = vpack.c.bf16 %v538_v14, %v535_v11  ;;  %s1874_s21 = sadd.s32 8, %s1866_s20 }
  0x33   : > { %v545_v19 = vld [vmem:[%s3862_s4 + $0x170] sm:$0xff]  ;;  %v493_v20 = vld [vmem:[%s3859_s1 + $0x8] sm:$0xff]  ;;  %v591_v21 = vld [vmem:[%s3862_s4 + $0x2e0] sm:$0xff]  ;;  %v2230_v24 = vpack.c.bf16 %v540_v16, %v537_v15 }
  0x34   : > { %2159 = vmatpush1.bf16.msra.mxu0 %v2158_v62  ;;  %v594_v22 = vld [vmem:[%s3862_s4 + $0x2f8] sm:$0xff]  ;;  %759 = vmatprep.mubr.f32.mxu1 %v493_v20  ;;  %v2168_v25 = vpack.c.bf16 %v545_v19, %v542_v18  ;;  %v541_v26 = vld [vmem:[%s3862_s4 + $0x150] sm:$0xff]  ;;  %v544_v27 = vld [vmem:[%s3862_s4 + $0x168] sm:$0xff] }
  0x35   : > { %2223 = vmatpush3.bf16.msra.mxu1 %v2222_v63  ;;  %2161 = vmatprep.subr.bf16.mxu0 %v2160_v0  ;;  %v543_v28 = vld [vmem:[%s3862_s4 + $0x160] sm:$0xff]  ;;  %v2232_v29 = vpack.c.bf16 %v594_v22, %v591_v21  ;;  %v546_v30 = vld [vmem:[%s3862_s4 + $0x178] sm:$0xff]  ;;  %v548_v31 = vld [vmem:[%s3862_s4 + $0x188] sm:$0xff]  ;;  %v2170_v35 = vpack.c.bf16 %v544_v27, %v541_v26 }
  0x36   : > { %2225 = vmatprep.subr.bf16.mxu1 %v2224_v4  ;;  %676 = vmatprep.mubr.f32.mxu0 %v493_v20  ;;  %v551_v32 = vld [vmem:[%s3862_s4 + $0x1a0] sm:$0xff]  ;;  %v776_v33 = vld [vmem:[%s3863_s5 + $0x8] sm:$0xff]  ;;  %v2234_v36 = vpack.c.bf16 %v546_v30, %v543_v28  ;;  %v550_v39 = vld [vmem:[%s3862_s4 + $0x198] sm:$0xff] }
  0x37   : > { %v779_v34 = vld [vmem:[%s3863_s5 + $0x20] sm:$0xff]  ;;  %v2172_v37 = vpack.c.bf16 %v551_v32, %v548_v31  ;;  %v778_v42 = vld [vmem:[%s3863_s5 + $0x18] sm:$0xff]  ;;  %v557_v44 = vld [vmem:[%s3862_s4 + $0x1d0] sm:$0xff] }
  0x38   : > { %2163 = vmatpush1.bf16.msra.mxu0 %v2162_v10  ;;  %v547_v38 = vld [vmem:[%s3862_s4 + $0x180] sm:$0xff]  ;;  %v2236_v41 = vpack.c.bf16 %v779_v34, %v776_v33  ;;  %v554_v43 = vld [vmem:[%s3862_s4 + $0x1b8] sm:$0xff]  ;;  %v785_v46 = vld [vmem:[%s3863_s5 + $0x50] sm:$0xff]  ;;  %v2655_v34 = vmov 0.0  }
  0x39   : > { %2227 = vmatpush3.bf16.msra.mxu1 %v2226_v12  ;;  %2165 = vmatprep.subr.bf16.mxu0 %v2164_v13  ;;  %v775_v40 = vld [vmem:[%s3863_s5] sm:$0xff]  ;;  %v782_v45 = vld [vmem:[%s3863_s5 + $0x38] sm:$0xff]  ;;  %v2174_v47 = vpack.c.bf16 %v550_v39, %v547_v38  ;;  %v2176_v50 = vpack.c.bf16 %v557_v44, %v554_v43  ;;  %v553_v51 = vld [vmem:[%s3862_s4 + $0x1b0] sm:$0xff] }
  0x3a   : > { %2229 = vmatprep.subr.bf16.mxu1 %v2228_v17  ;;  %v3027_v48 = vld [vmem:[%s3859_s1] sm:$0xff]  ;;  %v2238_v49 = vpack.c.bf16 %v778_v42, %v775_v40  ;;  %v556_v52 = vld [vmem:[%s3862_s4 + $0x1c8] sm:$0xff]  ;;  %v781_v53 = vld [vmem:[%s3863_s5 + $0x30] sm:$0xff]  ;;  %v2240_v54 = vpack.c.bf16 %v785_v46, %v782_v45 }
  0x3b   : > { %v784_v55 = vld [vmem:[%s3863_s5 + $0x48] sm:$0xff]  ;;  %v563_v57 = vld [vmem:[%s3862_s4 + $0x200] sm:$0xff]  ;;  %v2178_v60 = vpack.c.bf16 %v556_v52, %v553_v51  ;;  %v562_v0 = vld [vmem:[%s3862_s4 + $0x1f8] sm:$0xff] }
  0x3c   : > { %2167 = vmatpush1.bf16.msra.mxu0 %v2166_v23  ;;  %v560_v56 = vld [vmem:[%s3862_s4 + $0x1e8] sm:$0xff]  ;;  %v791_v59 = vld [vmem:[%s3863_s5 + $0x80] sm:$0xff]  ;;  %v2242_v62 = vpack.c.bf16 %v784_v55, %v781_v53  ;;  %v790_v2 = vld [vmem:[%s3863_s5 + $0x78] sm:$0xff] }
  0x3d   : > { %2231 = vmatpush3.bf16.msra.mxu1 %v2230_v24  ;;  %2169 = vmatprep.subr.bf16.mxu0 %v2168_v25  ;;  %v788_v58 = vld [vmem:[%s3863_s5 + $0x68] sm:$0xff]  ;;  %v559_v61 = vld [vmem:[%s3862_s4 + $0x1e0] sm:$0xff]  ;;  %v2180_v63 = vpack.c.bf16 %v563_v57, %v560_v56  ;;  %v566_v4 = vld [vmem:[%s3862_s4 + $0x218] sm:$0xff] }
  0x3e   : > { %2233 = vmatprep.subr.bf16.mxu1 %v2232_v29  ;;  %v787_v1 = vld [vmem:[%s3863_s5 + $0x60] sm:$0xff]  ;;  %v2244_v3 = vpack.c.bf16 %v791_v59, %v788_v58  ;;  %v569_v5 = vld [vmem:[%s3862_s4 + $0x230] sm:$0xff]  ;;  %v3075_v6 = vld [vmem:[%s3859_s1 + $0x18] sm:$0xff]  ;;  %v2182_v10 = vpack.c.bf16 %v562_v0, %v559_v61 }
  0x3f   : > { %v794_v7 = vld [vmem:[%s3863_s5 + $0x98] sm:$0xff]  ;;  %v797_v8 = vld [vmem:[%s3863_s5 + $0xb0] sm:$0xff]  ;;  %v568_v12 = vld [vmem:[%s3862_s4 + $0x228] sm:$0xff]  ;;  %v2246_v13 = vpack.c.bf16 %v790_v2, %v787_v1  ;;  %v2184_v14 = vpack.c.bf16 %v569_v5, %v566_v4 }
  0x40   : > { %2171 = vmatpush1.bf16.msra.mxu0 %v2170_v35  ;;  %v3087_v9 = vld [vmem:[%s3859_s1 + $0x10] sm:$0xff]  ;;  %v796_v16 = vld [vmem:[%s3863_s5 + $0xa8] sm:$0xff]  ;;  %v2248_v18 = vpack.c.bf16 %v797_v8, %v794_v7  ;;  %v575_v20 = vld [vmem:[%s3862_s4 + $0x260] sm:$0xff] }
  0x41   : > { %2235 = vmatpush3.bf16.msra.mxu1 %v2234_v36  ;;  %2173 = vmatprep.subr.bf16.mxu0 %v2172_v37  ;;  %v565_v11 = vld [vmem:[%s3862_s4 + $0x210] sm:$0xff]  ;;  %v3105_v17 = vld [vmem:[%s3859_s1 + $0x28] sm:$0xff]  ;;  %v3117_v21 = vld [vmem:[%s3859_s1 + $0x20] sm:$0xff] }
  0x42   : > { %2237 = vmatprep.subr.bf16.mxu1 %v2236_v41  ;;  %v793_v15 = vld [vmem:[%s3863_s5 + $0x90] sm:$0xff]  ;;  %v572_v19 = vld [vmem:[%s3862_s4 + $0x248] sm:$0xff]  ;;  %v803_v23 = vld [vmem:[%s3863_s5 + $0xe0] sm:$0xff]  ;;  %v2186_v24 = vpack.c.bf16 %v568_v12, %v565_v11 }
  0x43   : > { %v800_v22 = vld [vmem:[%s3863_s5 + $0xc8] sm:$0xff]  ;;  %v2250_v25 = vpack.c.bf16 %v796_v16, %v793_v15  ;;  %v2188_v26 = vpack.c.bf16 %v575_v20, %v572_v19  ;;  %v571_v27 = vld [vmem:[%s3862_s4 + $0x240] sm:$0xff]  ;;  %v574_v28 = vld [vmem:[%s3862_s4 + $0x258] sm:$0xff] }
  0x44   : > { %2175 = vmatpush1.bf16.msra.mxu0 %v2174_v47  ;;  %760 = vmatmul.mubr.f32.vlgmr.msra.gmra.mrb[0].mxu1 %v3027_v48  ;;  %v799_v29 = vld [vmem:[%s3863_s5 + $0xc0] sm:$0xff]  ;;  %v2252_v30 = vpack.c.bf16 %v803_v23, %v800_v22  ;;  %v802_v31 = vld [vmem:[%s3863_s5 + $0xd8] sm:$0xff]  ;;  %v581_v33 = vld [vmem:[%s3862_s4 + $0x290] sm:$0xff]  ;;  %v2190_v37 = vpack.c.bf16 %v574_v28, %v571_v27 }
  0x45   : > { %2239 = vmatpush1.bf16.msra.mxu1 %v2238_v49  ;;  %2177 = vmatprep.subr.bf16.mxu0 %v2176_v50  ;;  %v578_v32 = vld [vmem:[%s3862_s4 + $0x278] sm:$0xff]  ;;  %v809_v36 = vld [vmem:[%s3863_s5 + $0x110] sm:$0xff]  ;;  %v2254_v38 = vpack.c.bf16 %v802_v31, %v799_v29  ;;  %v580_v41 = vld [vmem:[%s3862_s4 + $0x288] sm:$0xff] }
  0x46   : > { %2241 = vmatprep.subr.bf16.mxu1 %v2240_v54  ;;  %764 = vmatprep.mubr.f32.mxu1 %v3075_v6  ;;  %v806_v35 = vld [vmem:[%s3863_s5 + $0xf8] sm:$0xff]  ;;  %v2192_v39 = vpack.c.bf16 %v581_v33, %v578_v32  ;;  %v577_v40 = vld [vmem:[%s3862_s4 + $0x270] sm:$0xff]  ;;  %v808_v44 = vld [vmem:[%s3863_s5 + $0x108] sm:$0xff] }
  0x47   : > { %v805_v42 = vld [vmem:[%s3863_s5 + $0xf0] sm:$0xff]  ;;  %v2256_v43 = vpack.c.bf16 %v809_v36, %v806_v35  ;;  %v584_v45 = vld [vmem:[%s3862_s4 + $0x2a8] sm:$0xff]  ;;  %v587_v46 = vld [vmem:[%s3862_s4 + $0x2c0] sm:$0xff]  ;;  %v2194_v50 = vpack.c.bf16 %v580_v41, %v577_v40 }
  0x48   : > { %2179 = vmatpush1.bf16.msra.mxu0 %v2178_v60  ;;  %765 = vmatmul.mubr.f32.gmra.mrb[2].mxu1 %v3087_v9  ;;  %v812_v47 = vld [vmem:[%s3863_s5 + $0x128] sm:$0xff]  ;;  %v815_v49 = vld [vmem:[%s3863_s5 + $0x140] sm:$0xff]  ;;  %v2258_v51 = vpack.c.bf16 %v808_v44, %v805_v42  ;;  %v2196_v52 = vpack.c.bf16 %v587_v46, %v584_v45  ;;  %v586_v54 = vld [vmem:[%s3862_s4 + $0x2b8] sm:$0xff] }
  0x49   : > { %2243 = vmatpush1.bf16.msra.mxu1 %v2242_v62  ;;  %2181 = vmatprep.subr.bf16.mxu0 %v2180_v63  ;;  %v583_v53 = vld [vmem:[%s3862_s4 + $0x2a0] sm:$0xff]  ;;  %v2260_v56 = vpack.c.bf16 %v815_v49, %v812_v47  ;;  %v814_v57 = vld [vmem:[%s3863_s5 + $0x138] sm:$0xff]  ;;  %v593_v59 = vld [vmem:[%s3862_s4 + $0x2f0] sm:$0xff] }
  0x4a   : > { %2245 = vmatprep.subr.bf16.mxu1 %v2244_v3  ;;  %769 = vmatprep.mubr.f32.mxu1 %v3105_v17  ;;  %v811_v55 = vld [vmem:[%s3863_s5 + $0x120] sm:$0xff]  ;;  %v590_v58 = vld [vmem:[%s3862_s4 + $0x2d8] sm:$0xff]  ;;  %v821_v61 = vld [vmem:[%s3863_s5 + $0x170] sm:$0xff]  ;;  %v2198_v62 = vpack.c.bf16 %v586_v54, %v583_v53 }
  0x4b   : > { %v818_v60 = vld [vmem:[%s3863_s5 + $0x158] sm:$0xff]  ;;  %v2262_v63 = vpack.c.bf16 %v814_v57, %v811_v55  ;;  %v2200_v0 = vpack.c.bf16 %v593_v59, %v590_v58  ;;  %v589_v1 = vld [vmem:[%s3862_s4 + $0x2d0] sm:$0xff]  ;;  %v592_v2 = vld [vmem:[%s3862_s4 + $0x2e8] sm:$0xff] }
  0x4c   : > { %2183 = vmatpush1.bf16.msra.mxu0 %v2182_v10  ;;  %770 = vmatmul.mubr.f32.gmra.mrb[4].mxu1 %v3117_v21  ;;  %v2264_v3 = vpack.c.bf16 %v821_v61, %v818_v60  ;;  %v817_v4 = vld [vmem:[%s3863_s5 + $0x150] sm:$0xff]  ;;  %v820_v5 = vld [vmem:[%s3863_s5 + $0x168] sm:$0xff]  ;;  %v2202_v7 = vpack.c.bf16 %v592_v2, %v589_v1  ;;  %v783_v15 = vld [vmem:[%s3863_s5 + $0x40] sm:$0xff] }
  0x4d   : > { %2247 = vmatpush1.bf16.msra.mxu1 %v2246_v13  ;;  %2185 = vmatprep.subr.bf16.mxu0 %v2184_v14  ;;  %v2266_v8 = vpack.c.bf16 %v820_v5, %v817_v4  ;;  %v777_v10 = vld [vmem:[%s3863_s5 + $0x10] sm:$0xff]  ;;  %v780_v11 = vld [vmem:[%s3863_s5 + $0x28] sm:$0xff]  ;;  %v3227_v13 = vld [vmem:[%s488_s27] sm:$0x1]  ;;  %v2656_v14 = vmov 0.0|0.0   ;;  %s3880_s27 = smul.u32 24, %s3738_s22 }
  0x4e   : > { %2249 = vmatprep.subr.bf16.mxu1 %v2248_v18  ;;  %904 = vmatprep.mubr.f32.mxu1 %v2655_v34  ;;  %v2269_v12 = vpack.c.bf16 %v780_v11, %v777_v10  ;;  %v786_v16 = vld [vmem:[%s3863_s5 + $0x58] sm:$0xff]  ;;  %v789_v19 = vld [vmem:[%s3863_s5 + $0x70] sm:$0xff]  ;;  %v792_v20 = vld [vmem:[%s3863_s5 + $0x88] sm:$0xff] }
  0x4f   : > { %v2272_v18 = vpack.c.bf16 %v786_v16, %v783_v15  ;;  %v798_v22 = vld [vmem:[%s3863_s5 + $0xb8] sm:$0xff]  ;;  %v813_v27 = vld [vmem:[%s3863_s5 + $0x130] sm:$0xff]  ;;  %v816_v28 = vld [vmem:[%s3863_s5 + $0x148] sm:$0xff] }
  0x50   : > { %2187 = vmatpush1.bf16.msra.mxu0 %v2186_v24  ;;  %v2287_v29 = vpack.c.bf16 %v816_v28, %v813_v27  ;;  %v822_v31 = vld [vmem:[%s3863_s5 + $0x178] sm:$0xff]  ;;  %v1064_v33 = vld [vmem:[%s3866_s8 + $0x8] sm:$0xff]  ;;  %v1067_v35 = vld [vmem:[%s3866_s8 + $0x20] sm:$0xff] }
  0x51   : > { %2251 = vmatpush1.bf16.msra.mxu1 %v2250_v25  ;;  %2189 = vmatprep.subr.bf16.mxu0 %v2188_v26  ;;  %v810_v25 = vld [vmem:[%s3863_s5 + $0x118] sm:$0xff]  ;;  %v2292_v36 = vpack.c.bf16 %v1067_v35, %v1064_v33  ;;  %v1065_v40 = vld [vmem:[%s3866_s8 + $0x10] sm:$0xff]  ;;  %v1068_v41 = vld [vmem:[%s3866_s8 + $0x28] sm:$0xff] }
  0x52   : > { %2253 = vmatprep.subr.bf16.mxu1 %v2252_v30  ;;  %v819_v30 = vld [vmem:[%s3863_s5 + $0x160] sm:$0xff]  ;;  %v2325_v42 = vpack.c.bf16 %v1068_v41, %v1065_v40  ;;  %v1073_v44 = vld [vmem:[%s3866_s8 + $0x50] sm:$0xff]  ;;  %v1072_v47 = vld [vmem:[%s3866_s8 + $0x48] sm:$0xff] }
  0x53   : > { %v2290_v32 = vpack.c.bf16 %v822_v31, %v819_v30  ;;  %v1069_v46 = vld [vmem:[%s3866_s8 + $0x30] sm:$0xff]  ;;  %v1076_v53 = vld [vmem:[%s3866_s8 + $0x68] sm:$0xff]  ;;  %v1079_v54 = vld [vmem:[%s3866_s8 + $0x80] sm:$0xff] }
  0x54   : > { %2191 = vmatpush1.bf16.msra.mxu0 %v2190_v37  ;;  %v1063_v37 = vld [vmem:[%s3866_s8] sm:$0xff]  ;;  %v2298_v49 = vpack.c.bf16 %v1072_v47, %v1069_v46  ;;  %v2300_v55 = vpack.c.bf16 %v1079_v54, %v1076_v53  ;;  %v1078_v57 = vld [vmem:[%s3866_s8 + $0x78] sm:$0xff]  ;;  %v1077_v59 = vld [vmem:[%s3866_s8 + $0x70] sm:$0xff] }
  0x55   : > { %2255 = vmatpush1.bf16.msra.mxu1 %v2254_v38  ;;  %2193 = vmatprep.subr.bf16.mxu0 %v2192_v39  ;;  %v1066_v38 = vld [vmem:[%s3866_s8 + $0x18] sm:$0xff]  ;;  %v1080_v60 = vld [vmem:[%s3866_s8 + $0x88] sm:$0xff]  ;;  %v1081_v1 = vld [vmem:[%s3866_s8 + $0x90] sm:$0xff] }
  0x56   : > { %2257 = vmatprep.subr.bf16.mxu1 %v2256_v43  ;;  %v2294_v39 = vpack.c.bf16 %v1066_v38, %v1063_v37  ;;  %v1070_v43 = vld [vmem:[%s3866_s8 + $0x38] sm:$0xff]  ;;  %v2331_v61 = vpack.c.bf16 %v1080_v60, %v1077_v59  ;;  %v1084_v2 = vld [vmem:[%s3866_s8 + $0xa8] sm:$0xff]  ;;  %v1083_v4 = vld [vmem:[%s3866_s8 + $0xa0] sm:$0xff] }
  0x57   : > { %v2296_v45 = vpack.c.bf16 %v1073_v44, %v1070_v43  ;;  %v1086_v5 = vld [vmem:[%s3866_s8 + $0xb8] sm:$0xff]  ;;  %v1091_v10 = vld [vmem:[%s3866_s8 + $0xe0] sm:$0xff]  ;;  %v1104_v33 = vld [vmem:[%s3866_s8 + $0x148] sm:$0xff] }
  0x58   : > { %2195 = vmatpush1.bf16.msra.mxu0 %v2194_v50  ;;  %v1071_v50 = vld [vmem:[%s3866_s8 + $0x40] sm:$0xff]  ;;  %v1090_v15 = vld [vmem:[%s3866_s8 + $0xd8] sm:$0xff]  ;;  %v1109_v37 = vld [vmem:[%s3866_s8 + $0x170] sm:$0xff] }
  0x59   : > { %2259 = vmatpush1.bf16.msra.mxu1 %v2258_v51  ;;  %2197 = vmatprep.subr.bf16.mxu0 %v2196_v52  ;;  %v1074_v51 = vld [vmem:[%s3866_s8 + $0x58] sm:$0xff]  ;;  %v1103_v27 = vld [vmem:[%s3866_s8 + $0x140] sm:$0xff]  ;;  %v1105_v38 = vld [vmem:[%s3866_s8 + $0x150] sm:$0xff] }
  0x5a   : > { %2261 = vmatprep.subr.bf16.mxu1 %v2260_v56  ;;  %v2328_v52 = vpack.c.bf16 %v1074_v51, %v1071_v50  ;;  %v1075_v56 = vld [vmem:[%s3866_s8 + $0x60] sm:$0xff]  ;;  %v1106_v35 = vld [vmem:[%s3866_s8 + $0x158] sm:$0xff]  ;;  %v1292_v43 = vld [vmem:[%s3867_s9 + $0x8] sm:$0xff] }
  0x5b   : > { %v2302_v58 = vpack.c.bf16 %v1078_v57, %v1075_v56  ;;  %v1099_v28 = vld [vmem:[%s3866_s8 + $0x120] sm:$0xff]  ;;  %v2320_v40 = vpack.c.bf16 %v1109_v37, %v1106_v35 }
  0x5c   : > { %2199 = vmatpush1.bf16.msra.mxu0 %v2198_v62  ;;  %v1082_v62 = vld [vmem:[%s3866_s8 + $0x98] sm:$0xff]  ;;  %v1107_v41 = vld [vmem:[%s3866_s8 + $0x160] sm:$0xff] }
  0x5d   : > { %2263 = vmatpush1.bf16.msra.mxu1 %v2262_v63  ;;  %2201 = vmatprep.subr.bf16.mxu0 %v2200_v0  ;;  %v1085_v63 = vld [vmem:[%s3866_s8 + $0xb0] sm:$0xff]  ;;  %v1295_v44 = vld [vmem:[%s3867_s9 + $0x20] sm:$0xff] }
  0x5e   : > { %2265 = vmatprep.subr.bf16.mxu1 %v2264_v3  ;;  %v2304_v0 = vpack.c.bf16 %v1085_v63, %v1082_v62  ;;  %v2306_v3 = vpack.c.bf16 %v1084_v2, %v1081_v1  ;;  %v2348_v47 = vpack.c.bf16 %v1295_v44, %v1292_v43  ;;  %v595_v63 = vld [vmem:[%s3864_s6] sm:$0x7] }
  0x60   : > { %2203 = vmatpush1.bf16.msra.mxu0 %v2202_v7  ;;  %v2334_v7 = vpack.c.bf16 %v1086_v5, %v1083_v4 }
  0x61   : > { %2267 = vmatpush1.bf16.msra.mxu1 %v2266_v8  ;;  %2268 = vmatprep.subr.bf16.mxu0 %v2656_v14  ;;  %v1088_v8 = vld [vmem:[%s3866_s8 + $0xc8] sm:$0xff] }
  0x62   : > { %2293 = vmatprep.subr.bf16.mxu1 %v2292_v36  ;;  %v2308_v11 = vpack.c.bf16 %v1091_v10, %v1088_v8 }
  0x63   : > { %677 = vmatmul.mubr.f32.vlgmr.msra.gmra.mrb[0].mxu0 %v3027_v48  ;;  %v2275_v48 = vpack.c.bf16 %v792_v20, %v789_v19  ;;  %v1092_v19 = vld [vmem:[%s3866_s8 + $0xe8] sm:$0xff] }
  0x64   : > { %905 = vmatmul.mubr.f32.vlgmr.msra.gmra.mrb[6].mxu1 %v3227_v13  ;;  %2270 = vmatpush3.bf16.msra.mxu0 %v2269_v12  ;;  %v1087_v12 = vld [vmem:[%s3866_s8 + $0xc0] sm:$0xff] }
  0x65   : > { %682 = vmatprep.mubr.f32.mxu0 %v3075_v6  ;;  %2271 = vmatprep.subr.bf16.mxu0 %v2656_v14  ;;  %v795_v6 = vld [vmem:[%s3863_s5 + $0xa0] sm:$0xff]  ;;  %v2310_v16 = vpack.c.bf16 %v1090_v15, %v1087_v12 }
  0x66   : > { %1192 = vmatprep.mubr.f32.mxu1 %v2655_v34  ;;  %v2278_v23 = vpack.c.bf16 %v798_v22, %v795_v6  ;;  %2295 = vmatpush1.bf16.msra.mxu1 %v2294_v39  ;;  %v1097_v6 = vld [vmem:[%s3866_s8 + $0x110] sm:$0xff]  ;;  %v1108_v39 = vld [vmem:[%s3866_s8 + $0x168] sm:$0xff] }
  0x67   : > { %683 = vmatmul.mubr.f32.gmra.mrb[2].mxu0 %v3087_v9  ;;  %v801_v9 = vld [vmem:[%s3863_s5 + $0xd0] sm:$0xff]  ;;  %2297 = vmatprep.subr.bf16.mxu1 %v2296_v45  ;;  %v2322_v45 = vpack.c.bf16 %v1108_v39, %v1105_v38 }
  0x68   : > { %2273 = vmatpush3.bf16.msra.mxu0 %v2272_v18  ;;  %688 = vmatprep.mubr.f32.mxu0 %v3105_v17  ;;  %v804_v17 = vld [vmem:[%s3863_s5 + $0xe8] sm:$0xff]  ;;  %v1089_v18 = vld [vmem:[%s3866_s8 + $0xd0] sm:$0xff] }
  0x69   : > { %2274 = vmatprep.subr.bf16.mxu0 %v2656_v14  ;;  %v2281_v24 = vpack.c.bf16 %v804_v17, %v801_v9  ;;  %v2337_v20 = vpack.c.bf16 %v1092_v19, %v1089_v18  ;;  %v1096_v9 = vld [vmem:[%s3866_s8 + $0x108] sm:$0xff] }
  0x6a   : > { %2299 = vmatpush1.bf16.msra.mxu1 %v2298_v49 }
  0x6b   : > { %689 = vmatmul.mubr.f32.gmra.mrb[4].mxu0 %v3117_v21  ;;  %v807_v21 = vld [vmem:[%s3863_s5 + $0x100] sm:$0xff]  ;;  %2301 = vmatprep.subr.bf16.mxu1 %v2300_v55 }
  0x6c   : > { %2276 = vmatpush3.bf16.msra.mxu0 %v2275_v48  ;;  %2020 = vmatprep.mubr.msk.f32.mxu0 %vm2657_vm0, %v2655_v34  ;;  %v2284_v26 = vpack.c.bf16 %v810_v25, %v807_v21  ;;  %v1094_v48 = vld [vmem:[%s3866_s8 + $0xf8] sm:$0xff]  ;;  %v1100_v25 = vld [vmem:[%s3866_s8 + $0x128] sm:$0xff] }
  0x6d   : > { %2277 = vmatprep.subr.bf16.mxu0 %v2656_v14  ;;  %v2312_v22 = vpack.c.bf16 %v1097_v6, %v1094_v48  ;;  %v1098_v21 = vld [vmem:[%s3866_s8 + $0x118] sm:$0xff]  ;;  %v2316_v30 = vpack.c.bf16 %v1103_v27, %v1100_v25 }
  0x6e   : > { %2303 = vmatpush1.bf16.msra.mxu1 %v2302_v58  ;;  %v597_v58 = vlaneseq }
  0x6f   : > { %2305 = vmatprep.subr.bf16.mxu1 %v2304_v0 }
  0x70   : > { %2279 = vmatpush3.bf16.msra.mxu0 %v2278_v23  ;;  %v1093_v23 = vld [vmem:[%s3866_s8 + $0xf0] sm:$0xff]  ;;  %v3456_v59 = vshrl.u32 %v597_v58, 7 }
  0x71   : > { %2280 = vmatprep.subr.bf16.mxu0 %v2656_v14  ;;  %v2314_v17 = vpack.c.bf16 %v1096_v9, %v1093_v23 }
  0x72   : > { %2307 = vmatpush1.bf16.msra.mxu1 %v2306_v3  ;;  %v3459_v60 = vsub.s32 0, %v3456_v59  ;;  %v3467_v62 = vsub.s32 1, %v3456_v59 }
  0x73   : > { %2309 = vmatprep.subr.bf16.mxu1 %v2308_v11 }
  0x74   : > { %2282 = vmatpush3.bf16.msra.mxu0 %v2281_v24  ;;  %v1095_v24 = vld [vmem:[%s3866_s8 + $0x100] sm:$0xff]  ;;  %v600_v0 = vrot.slane %v595_v63, %v3459_v60  ;;  %v604_v5 = vrot.slane %v595_v63, %v3467_v62 }
  0x75   : > { %2283 = vmatprep.subr.bf16.mxu0 %v2656_v14 }
  0x76   : > { %2311 = vmatpush1.bf16.msra.mxu1 %v2310_v16 }
  0x77   : > { %2313 = vmatprep.subr.bf16.mxu1 %v2312_v22 }
  0x78   : > { %2285 = vmatpush3.bf16.msra.mxu0 %v2284_v26  ;;  %v2340_v26 = vpack.c.bf16 %v1098_v21, %v1095_v24 }
  0x79   : > { %2286 = vmatprep.subr.bf16.mxu0 %v2656_v14 }
  0x7a   : > { %2315 = vmatpush1.bf16.msra.mxu1 %v2314_v17 }
  0x7b   : > { %2317 = vmatprep.subr.bf16.mxu1 %v2316_v30 }
  0x7c   : > { %2288 = vmatpush3.bf16.msra.mxu0 %v2287_v29  ;;  %v1102_v29 = vld [vmem:[%s3866_s8 + $0x138] sm:$0xff] }
  0x7d   : > { %2289 = vmatprep.subr.bf16.mxu0 %v2656_v14  ;;  %v2318_v31 = vpack.c.bf16 %v1102_v29, %v1099_v28 }
  0x7f   : > { %2319 = vmatpush1.bf16.msra.mxu1 %v2318_v31 }
  0x80   : > { %2291 = vmatpush3.bf16.msra.mxu0 %v2290_v32  ;;  %v1101_v32 = vld [vmem:[%s3866_s8 + $0x130] sm:$0xff]  ;;  %2321 = vmatprep.subr.bf16.mxu1 %v2320_v40 }
  0x81   : > { %2324 = vmatprep.subr.bf16.mxu0 %v2656_v14  ;;  %v2343_v36 = vpack.c.bf16 %v1104_v33, %v1101_v32 }
  0x83   : > { %2021 = vmatmul.mubr.f32.vlgmr.msra.gmra.mrb[6].mxu0 %v3227_v13  ;;  %2323 = vmatpush1.bf16.msra.mxu1 %v2322_v45 }
  0x84   : > { %2055 = vmatprep.mubr.msk.f32.mxu0 %vm2657_vm0, %v2655_v34  ;;  %2326 = vmatpush3.bf16.msra.mxu0 %v2325_v42  ;;  %v1110_v42 = vld [vmem:[%s3866_s8 + $0x178] sm:$0xff] }
  0x85   : > { %2327 = vmatprep.subr.bf16.mxu0 %v2656_v14  ;;  %v2346_v46 = vpack.c.bf16 %v1110_v42, %v1107_v41  ;;  %2349 = vmatprep.subr.bf16.mxu1 %v2348_v47  ;;  %v3481_v47 = vsub.s32 2, %v3456_v59 }
  0x88   : > { %2329 = vmatpush3.bf16.msra.mxu0 %v2328_v52 }
  0x89   : > { %2330 = vmatprep.subr.bf16.mxu0 %v2656_v14 }
  0x8c   : > { %2332 = vmatpush3.bf16.msra.mxu0 %v2331_v61  ;;  %v3464_v61 = vld [vmem:[%s3865_s7] sm:$0x7] }
  0x8d   : > { %2333 = vmatprep.subr.bf16.mxu0 %v2656_v14  ;;  %v828_v1 = vrot.slane %v3464_v61, %v3459_v60  ;;  %v832_v2 = vrot.slane %v3464_v61, %v3467_v62 }
  0x90   : > { %2335 = vmatpush3.bf16.msra.mxu0 %v2334_v7 }
  0x91   : > { %2336 = vmatprep.subr.bf16.mxu0 %v2656_v14 }
  0x94   : > { %2338 = vmatpush3.bf16.msra.mxu0 %v2337_v20 }
  0x95   : > { %2339 = vmatprep.subr.bf16.mxu0 %v2656_v14 }
  0x98   : > { %2341 = vmatpush3.bf16.msra.mxu0 %v2340_v26 }
  0x99   : > { %2342 = vmatprep.subr.bf16.mxu0 %v2656_v14 }
  0x9c   : > { %2344 = vmatpush3.bf16.msra.mxu0 %v2343_v36 }
  0x9d   : > { %2345 = vmatprep.subr.bf16.mxu0 %v2656_v14 }
  0xa0   : > { %2347 = vmatpush3.bf16.msra.mxu0 %v2346_v46 }
  0xa1   : > { %2380 = vmatprep.subr.bf16.mxu0 %v2656_v14 }
 0x117   : > { %v1907_v49 = vpop.f32.mrb[0].mxu1 }
 0x118   : > { %v1908_v50 = vpop.f32.mrb[1].mxu1 }
 0x119   : > { %v3450_v51 = vadd.f32 %v1908_v50, %v1907_v49  ;;  %v836_v50 = vrot.slane %v3464_v61, %v3481_v47 }
 0x11b   : > { %v1910_v52 = vpop.f32.mrb[2].mxu1 }
 0x11c   : > { %v1911_v53 = vpop.f32.mrb[3].mxu1 }
 0x11d   : > { %v3452_v54 = vadd.f32 %v1911_v53, %v1910_v52  ;;  %v1054_v52 = vrot.slane %v3227_v13, %v3459_v60  ;;  %v608_v53 = vrot.slane %v595_v63, %v3481_v47 }
 0x11f   : > { %v1913_v55 = vpop.f32.mrb[4].mxu1 }
 0x120   : > { %v1914_v56 = vpop.f32.mrb[5].mxu1 }
 0x121   : > { %v3454_v57 = vadd.f32 %v1914_v56, %v1913_v55 }
 0x123   : > { %v772_v63 = vadd.f32 %v3454_v57, %v608_v53  ;;  %v1298_v57 = vld [vmem:[%s3867_s9 + $0x38] sm:$0xff] }
 0x136   : > { %v678_v3 = vpop.f32.mrb[0].mxu0 }
 0x137   : > { %v906_v4 = vpop.f32.mrb[6].mxu1  ;;  %v680_v7 = vpop.f32.mrb[1].mxu0  ;;  %v679_v8 = vadd.f32 %v678_v3, %v600_v0 }
 0x138   : > { %v907_v10 = vadd.f32 %v906_v4, %v828_v1  ;;  %v908_v11 = vpop.f32.mrb[7].mxu1  ;;  %v681_v18 = vadd.f32 %v680_v7, %v604_v5  ;;  %v762_v7 = vadd.f32 %v3450_v51, %v608_v53  ;;  %v1291_v51 = vld [vmem:[%s3867_s9] sm:$0xff] }
 0x139   : > { %v909_v12 = vadd.f32 %v908_v11, %v832_v2 }
 0x13a   : > { %v984_v15 = vrot.slane %v907_v10, %v3459_v60  ;;  %v684_v16 = vpop.f32.mrb[2].mxu0 }
 0x13b   : > { %v1009_v19 = vrot.slane %v909_v12, %v3459_v60  ;;  %v685_v20 = vadd.f32 %v684_v16, %v600_v0  ;;  %v686_v48 = vpop.f32.mrb[3].mxu0 }
 0x13c   : > { %v985_v6 = vadd.f32 %v984_v15, %v679_v8  ;;  %v687_v22 = vadd.f32 %v686_v48, %v604_v5  ;;  %v767_v8 = vadd.f32 %v3452_v54, %v608_v53  ;;  %v1294_v54 = vld [vmem:[%s3867_s9 + $0x18] sm:$0xff]  ;;  %v1309_v53 = vld [vmem:[%s3867_s9 + $0x90] sm:$0xff] }
 0x13d   : > { %v1010_v23 = vadd.f32 %v1009_v19, %v681_v18  ;;  %v986_v9 = vadd.f32 %v984_v15, %v685_v20 }
 0x13e   : > { %v1854_v17 = vmul.f32 -1.442695, %v985_v6  ;;  %v1011_v24 = vadd.f32 %v1009_v19, %v687_v22  ;;  %v690_v21 = vpop.f32.mrb[4].mxu0  ;;  %v1301_v22 = vld [vmem:[%s3867_s9 + $0x50] sm:$0xff] }
 0x13f   : > { %v1857_v25 = vmul.f32 -1.442695, %v1010_v23  ;;  %v1855_v26 = vmul.f32 -1.442695, %v986_v9  ;;  %v691_v27 = vadd.f32 %v690_v21, %v600_v0  ;;  %v692_v28 = vpop.f32.mrb[5].mxu0  ;;  %v1293_v21 = vld [vmem:[%s3867_s9 + $0x10] sm:$0xff] }
 0x140   : > { %2481 = vpow2.f32 %v1854_v17  ;;  %v1858_v29 = vmul.f32 -1.442695, %v1011_v24  ;;  %v693_v30 = vadd.f32 %v692_v28, %v604_v5 }
 0x141   : > { %2483 = vpow2.f32 %v1857_v25  ;;  %v987_v31 = vadd.f32 %v984_v15, %v691_v27  ;;  %v1296_v25 = vld [vmem:[%s3867_s9 + $0x28] sm:$0xff]  ;;  %v2350_v27 = vpack.c.bf16 %v1294_v54, %v1291_v51 }
 0x142   : > { %2485 = vpow2.f32 %v1855_v26  ;;  %v1012_v32 = vadd.f32 %v1009_v19, %v693_v30  ;;  %v2352_v30 = vpack.c.bf16 %v1301_v22, %v1298_v57  ;;  %v1320_v51 = vld [vmem:[%s3867_s9 + $0xe8] sm:$0xff]  ;;  %v1327_v57 = vld [vmem:[%s3867_s9 + $0x120] sm:$0xff]  ;;  %v1330_v22 = vld [vmem:[%s3867_s9 + $0x138] sm:$0xff] }
 0x143   : > { %2487 = vpow2.f32 %v1858_v29  ;;  %v1856_v33 = vmul.f32 -1.442695, %v987_v31  ;;  %v1297_v31 = vld [vmem:[%s3867_s9 + $0x30] sm:$0xff] }
 0x144   : > { %v1859_v35 = vmul.f32 -1.442695, %v1012_v32  ;;  %v1300_v32 = vld [vmem:[%s3867_s9 + $0x48] sm:$0xff] }
 0x145   : > { %2489 = vpow2.f32 %v1856_v33 }
 0x146   : > { %2491 = vpow2.f32 %v1859_v35 }
 0x14a   : > { %v2482_v36 = vpop.eup %2481 }
 0x14b   : > { %v2484_v37 = vpop.eup %2483  ;;  %v997_v38 = vadd.f32 1.0, %v2482_v36  ;;  %v1304_v36 = vld [vmem:[%s3867_s9 + $0x68] sm:$0xff] }
 0x14c   : > { %v2486_v39 = vpop.eup %2485  ;;  %v1022_v40 = vadd.f32 1.0, %v2484_v37  ;;  %v1307_v37 = vld [vmem:[%s3867_s9 + $0x80] sm:$0xff] }
 0x14d   : > { %v2488_v41 = vpop.eup %2487  ;;  %2493 = vrcp.f32 %v997_v38  ;;  %v998_v42 = vadd.f32 1.0, %v2486_v39  ;;  %v2381_v38 = vpack.c.bf16 %v1296_v25, %v1293_v21  ;;  %v1326_v21 = vld [vmem:[%s3867_s9 + $0x118] sm:$0xff]  ;;  %v2374_v25 = vpack.c.bf16 %v1330_v22, %v1327_v57 }
 0x14e   : > { %2495 = vrcp.f32 %v1022_v40  ;;  %v1023_v43 = vadd.f32 1.0, %v2488_v41  ;;  %v2354_v40 = vpack.c.bf16 %v1300_v32, %v1297_v31  ;;  %v2356_v41 = vpack.c.bf16 %v1307_v37, %v1304_v36  ;;  %v1332_v31 = vld [vmem:[%s3867_s9 + $0x148] sm:$0xff]  ;;  %v1338_v36 = vld [vmem:[%s3867_s9 + $0x178] sm:$0xff]  ;;  %v3649_v37 = vld [vmem:[%s491_s24] sm:$0x1]  ;;  %s478_s24 = scalar_lea.vmem [#allocation4], %s3880_s27 }
 0x14f   : > { %v2490_v44 = vpop.eup %2489  ;;  %2497 = vrcp.f32 %v998_v42  ;;  %v1303_v42 = vld [vmem:[%s3867_s9 + $0x60] sm:$0xff]  ;;  %s1734_s18 = sshll.u32 %s478_s24, 4  ;;  %s3763_s18 = int_to_ptr.vmem [resolvable:$true] %s1734_s18 }
 0x150   : > { %v2492_v45 = vpop.eup %2491  ;;  %2499 = vrcp.f32 %v1023_v43  ;;  %v999_v46 = vadd.f32 1.0, %v2490_v44  ;;  %v1306_v43 = vld [vmem:[%s3867_s9 + $0x78] sm:$0xff]  ;;  %s2556_s30 = scalar_lea.vmem %s3763_s18, 384 }
 0x151   : > { %v1024_v49 = vadd.f32 1.0, %v2492_v45  ;;  %v1310_v44 = vld [vmem:[%s3867_s9 + $0x98] sm:$0xff]  ;;  %v1313_v45 = vld [vmem:[%s3867_s9 + $0xb0] sm:$0xff]  ;;  %p2557_p2 = scmp.ne.s32.totalorder %s3763_s18, %s2556_s30 }
 0x152   : > { %2501 = vrcp.f32 %v999_v46  ;;  %v1299_v46 = vld [vmem:[%s3867_s9 + $0x40] sm:$0xff] }
 0x153   : > { %2503 = vrcp.f32 %v1024_v49  ;;  %v1302_v49 = vld [vmem:[%s3867_s9 + $0x58] sm:$0xff]  ;;  %p2558_p3 = pnand %p2557_p2, %p2783_p10 }
 0x155   : > { %p2559_p4 = pneg %p2558_p3 }
 0x156   : > { %v977_v55 = vpop.f32.mrb[6].mxu0 }
 0x157   : > { %v2494_v56 = vpop.eup %2493  ;;  %v978_v58 = vadd.f32 %v977_v55, %v836_v50  ;;  %v2022_v0 = vpop.f32.mrb[7].mxu0  ;;  %v2358_v50 = vpack.c.bf16 %v1306_v43, %v1303_v42  ;;  %v1312_v55 = vld [vmem:[%s3867_s9 + $0xa8] sm:$0xff]  ;;  %v1611_v42 = vld [vmem:[%s3870_s12 + $0x10] sm:$0xff]  ;;  %v1612_v43 = vld [vmem:[%s3870_s12 + $0x18] sm:$0xff] }
 0x158   : > { %v2496_v1 = vpop.eup %2495  ;;  %v1319_v0 = vld [vmem:[%s3867_s9 + $0xe0] sm:$0xff] }
 0x159   : > { %v2498_v2 = vpop.eup %2497  ;;  %v1034_v3 = vrot.slane %v978_v58, %v3459_v60  ;;  %v1056_v4 = vmul.f32 %v2496_v1, %v1054_v52  ;;  %v1044_v48 = vsub.f32 1.0, %v2496_v1  ;;  %v2384_v58 = vpack.c.bf16 %v1302_v49, %v1299_v46  ;;  %v1305_v1 = vld [vmem:[%s3867_s9 + $0x70] sm:$0xff]  ;;  %v1614_v46 = vld [vmem:[%s3870_s12 + $0x28] sm:$0xff] }
 0x15a   : > { %v2500_v5 = vpop.eup %2499 }
 0x15b   : > { %v1035_v61 = vmul.f32 %v2494_v56, %v1034_v3  ;;  %v1036_v10 = vmul.f32 %v2498_v2, %v1034_v3  ;;  %v1057_v11 = vmul.f32 %v2500_v5, %v1054_v52  ;;  %v1045_v23 = vsub.f32 1.0, %v2500_v5  ;;  %v1316_v56 = vld [vmem:[%s3867_s9 + $0xc8] sm:$0xff]  ;;  %v1315_v5 = vld [vmem:[%s3867_s9 + $0xc0] sm:$0xff] }
 0x15c   : > { %v2502_v13 = vpop.eup %2501  ;;  %v1308_v2 = vld [vmem:[%s3867_s9 + $0x88] sm:$0xff] }
 0x15d   : > { %v2504_v12 = vpop.eup %2503  ;;  %v1037_v15 = vmul.f32 %v2502_v13, %v1034_v3  ;;  %v1038_v16 = vadd.f32 %v1035_v61, %v762_v7  ;;  %v1039_v18 = vadd.f32 %v1036_v10, %v767_v8  ;;  %v2362_v3 = vpack.c.bf16 %v1312_v55, %v1309_v53  ;;  %v1318_v7 = vld [vmem:[%s3867_s9 + $0xd8] sm:$0xff]  ;;  %v1325_v10 = vld [vmem:[%s3867_s9 + $0x110] sm:$0xff]  ;;  %v1617_v55 = vld [vmem:[%s3870_s12 + $0x40] sm:$0xff] }
 0x15e   : > { %v1058_v19 = vmul.f32 %v2504_v12, %v1054_v52  ;;  %v1046_v24 = vsub.f32 1.0, %v2504_v12  ;;  %v2360_v52 = vpack.c.bf16 %v1313_v45, %v1310_v44  ;;  %v1322_v8 = vld [vmem:[%s3867_s9 + $0xf8] sm:$0xff]  ;;  %v2387_v61 = vpack.c.bf16 %v1308_v2, %v1305_v1  ;;  %v1613_v45 = vld [vmem:[%s3870_s12 + $0x20] sm:$0xff] }
 0x15f   : > { %v1040_v20 = vadd.f32 %v1037_v15, %v772_v63  ;;  %2505 = vtanh.f32 %v1038_v16  ;;  %v1314_v13 = vld [vmem:[%s3867_s9 + $0xb8] sm:$0xff]  ;;  %v2366_v12 = vpack.c.bf16 %v1318_v7, %v1315_v5  ;;  %v2368_v63 = vpack.c.bf16 %v1325_v10, %v1322_v8  ;;  %v1321_v15 = vld [vmem:[%s3867_s9 + $0xf0] sm:$0xff]  ;;  %v1324_v16 = vld [vmem:[%s3867_s9 + $0x108] sm:$0xff] }
 0x160   : > { %2507 = vtanh.f32 %v1039_v18  ;;  %v1328_v18 = vld [vmem:[%s3867_s9 + $0x128] sm:$0xff]  ;;  %v2370_v54 = vpack.c.bf16 %v1324_v16, %v1321_v15  ;;  %v2408_v44 = vpack.c.bf16 %v1612_v43, %v1611_v42  ;;  %v2411_v49 = vpack.c.bf16 %v1614_v46, %v1613_v45  ;;  %v1620_v1 = vld [vmem:[%s3870_s12 + $0x58] sm:$0xff]  ;;  %v1623_v7 = vld [vmem:[%s3870_s12 + $0x70] sm:$0xff] }
 0x161   : > { %2509 = vtanh.f32 %v1040_v20  ;;  %v1331_v20 = vld [vmem:[%s3867_s9 + $0x140] sm:$0xff]  ;;  %v1624_v8 = vld [vmem:[%s3870_s12 + $0x78] sm:$0xff] }
 0x169   : > { %v2506_v6 = vpop.eup %2505 }
 0x16a   : > { %v2508_v9 = vpop.eup %2507  ;;  %v1047_v17 = vmul.f32 %v2506_v6, %v1044_v48  ;;  %v1317_v48 = vld [vmem:[%s3867_s9 + $0xd0] sm:$0xff]  ;;  %v2372_v6 = vpack.c.bf16 %v1331_v20, %v1328_v18 }
 0x16b   : > { %v2510_v26 = vpop.eup %2509  ;;  %v1048_v28 = vmul.f32 %v2508_v9, %v1045_v23  ;;  %v1334_v23 = vld [vmem:[%s3867_s9 + $0x158] sm:$0xff]  ;;  %v2393_v9 = vpack.c.bf16 %v1320_v51, %v1317_v48 }
 0x16c   : > { %v1059_v29 = vadd.f32 %v1056_v4, %v1047_v17  ;;  %v1049_v33 = vmul.f32 %v2510_v26, %v1046_v24  ;;  %v2364_v4 = vpack.c.bf16 %v1319_v0, %v1316_v56  ;;  %v1337_v17 = vld [vmem:[%s3867_s9 + $0x170] sm:$0xff]  ;;  %v1323_v24 = vld [vmem:[%s3867_s9 + $0x100] sm:$0xff]  ;;  %v1618_v56 = vld [vmem:[%s3870_s12 + $0x48] sm:$0xff] }
 0x16d   : > { %v1060_v35 = vadd.f32 %v1057_v11, %v1048_v28  ;;  %v1311_v11 = vld [vmem:[%s3867_s9 + $0xa0] sm:$0xff]  ;;  %v2376_v26 = vpack.c.bf16 %v1337_v17, %v1334_v23  ;;  %v1336_v28 = vld [vmem:[%s3867_s9 + $0x168] sm:$0xff]  ;;  %v2417_v0 = vpack.c.bf16 %v1618_v56, %v1617_v55 }
 0x16e   : > { %1193 = vmatmul.mubr.f32.vlgmr.msra.gmra.mrb[8].mxu1 %v1059_v29  ;;  %2056 = vmatmul.mubr.f32.vlgmr.msra.gmra.mrb[8].mxu0 %v1059_v29  ;;  %v1061_v39 = vadd.f32 %v1058_v19, %v1049_v33  ;;  %v2390_v19 = vpack.c.bf16 %v1314_v13, %v1311_v11  ;;  %v2396_v29 = vpack.c.bf16 %v1326_v21, %v1323_v24 }
 0x16f   : > { %2351 = vmatpush1.bf16.msra.mxu1 %v2350_v27  ;;  %1198 = vmatprep.mubr.f32.mxu1 %v2655_v34  ;;  %v1333_v27 = vld [vmem:[%s3867_s9 + $0x150] sm:$0xff] }
 0x170   : > { %2058 = vmatprep.mubr.msk.f32.mxu0 %vm2657_vm0, %v2655_v34  ;;  %2353 = vmatprep.subr.bf16.mxu1 %v2352_v30  ;;  %v1329_v30 = vld [vmem:[%s3867_s9 + $0x130] sm:$0xff]  ;;  %v2378_v32 = vpack.c.bf16 %v1336_v28, %v1333_v27 }
 0x171   : > { %2382 = vmatpush3.bf16.msra.mxu0 %v2381_v38  ;;  %v2399_v33 = vpack.c.bf16 %v1332_v31, %v1329_v30 }
 0x172   : > { %1199 = vmatmul.mubr.f32.gmra.mrb[10].mxu1 %v1060_v35  ;;  %2059 = vmatmul.mubr.f32.gmra.mrb[10].mxu0 %v1060_v35  ;;  %v1335_v35 = vld [vmem:[%s3867_s9 + $0x160] sm:$0xff] }
 0x173   : > { %2355 = vmatpush1.bf16.msra.mxu1 %v2354_v40  ;;  %1204 = vmatprep.mubr.f32.mxu1 %v2655_v34  ;;  %v2402_v38 = vpack.c.bf16 %v1338_v36, %v1335_v35  ;;  %v1610_v40 = vld [vmem:[%s3870_s12 + $0x8] sm:$0xff] }
 0x174   : > { %2061 = vmatprep.mubr.msk.f32.mxu0 %vm2657_vm0, %v2655_v34  ;;  %2357 = vmatprep.subr.bf16.mxu1 %v2356_v41 }
 0x175   : > { %2383 = vmatprep.subr.bf16.mxu0 %v2656_v14 }
 0x176   : > { %1205 = vmatmul.mubr.f32.gmra.mrb[12].mxu1 %v1061_v39  ;;  %2062 = vmatmul.mubr.f32.gmra.mrb[12].mxu0 %v1061_v39  ;;  %v1609_v39 = vld [vmem:[%s3870_s12] sm:$0xff] }
 0x177   : > { %2359 = vmatpush1.bf16.msra.mxu1 %v2358_v50  ;;  %1420 = vmatprep.mubr.f32.mxu1 %v2655_v34  ;;  %v2405_v41 = vpack.c.bf16 %v1610_v40, %v1609_v39  ;;  %v1615_v50 = vld [vmem:[%s3870_s12 + $0x30] sm:$0xff] }
 0x178   : > { %2361 = vmatprep.subr.bf16.mxu1 %v2360_v52  ;;  %2385 = vmatpush3.bf16.msra.mxu0 %v2384_v58  ;;  %v1616_v52 = vld [vmem:[%s3870_s12 + $0x38] sm:$0xff]  ;;  %v1619_v58 = vld [vmem:[%s3870_s12 + $0x50] sm:$0xff] }
 0x179   : > { %2386 = vmatprep.subr.bf16.mxu0 %v2656_v14  ;;  %2096 = vmatprep.mubr.msk.f32.mxu0 %vm2657_vm0, %v2655_v34  ;;  %v2414_v53 = vpack.c.bf16 %v1616_v52, %v1615_v50  ;;  %v2420_v2 = vpack.c.bf16 %v1620_v1, %v1619_v58 }
 0x17b   : > { %2363 = vmatpush1.bf16.msra.mxu1 %v2362_v3  ;;  %v1621_v3 = vld [vmem:[%s3870_s12 + $0x60] sm:$0xff] }
 0x17c   : > { %2365 = vmatprep.subr.bf16.mxu1 %v2364_v4  ;;  %2388 = vmatpush3.bf16.msra.mxu0 %v2387_v61  ;;  %v1622_v4 = vld [vmem:[%s3870_s12 + $0x68] sm:$0xff]  ;;  %v2426_v61 = vpack.c.bf16 %v1624_v8, %v1623_v7 }
 0x17d   : > { %2389 = vmatprep.subr.bf16.mxu0 %v2656_v14  ;;  %v2423_v5 = vpack.c.bf16 %v1622_v4, %v1621_v3 }
 0x17f   : > { %2367 = vmatpush1.bf16.msra.mxu1 %v2366_v12 }
 0x180   : > { %2369 = vmatprep.subr.bf16.mxu1 %v2368_v63  ;;  %2391 = vmatpush3.bf16.msra.mxu0 %v2390_v19 }
 0x181   : > { %2392 = vmatprep.subr.bf16.mxu0 %v2656_v14 }
 0x183   : > { %2371 = vmatpush1.bf16.msra.mxu1 %v2370_v54  ;;  %v1111_v54 = vld [vmem:[%s3868_s10] sm:$0x7] }
 0x184   : > { %2373 = vmatprep.subr.bf16.mxu1 %v2372_v6  ;;  %2394 = vmatpush3.bf16.msra.mxu0 %v2393_v9  ;;  %v1116_v22 = vrot.slane %v1111_v54, %v3459_v60  ;;  %v1120_v23 = vrot.slane %v1111_v54, %v3467_v62 }
 0x185   : > { %2395 = vmatprep.subr.bf16.mxu0 %v2656_v14 }
 0x187   : > { %2375 = vmatpush1.bf16.msra.mxu1 %v2374_v25 }
 0x188   : > { %2377 = vmatprep.subr.bf16.mxu1 %v2376_v26  ;;  %2397 = vmatpush3.bf16.msra.mxu0 %v2396_v29 }
 0x189   : > { %2398 = vmatprep.subr.bf16.mxu0 %v2656_v14 }
 0x18b   : > { %2379 = vmatpush1.bf16.msra.mxu1 %v2378_v32 }
 0x18c   : > { %2400 = vmatpush3.bf16.msra.mxu0 %v2399_v33  ;;  %2404 = vmatprep.subr.bf16.mxu1 %v2656_v14 }
 0x18d   : > { %2401 = vmatprep.subr.bf16.mxu0 %v2656_v14 }
 0x18e   : > { %1421 = vmatmul.mubr.f32.vlgmr.msra.gmra.mrb[14].mxu1 %v3649_v37 }
 0x18f   : > { %2131 = vmatprep.mubr.msk.f32.mxu1 %vm2657_vm0, %v2655_v34  ;;  %2406 = vmatpush3.bf16.msra.mxu1 %v2405_v41 }
 0x190   : > { %2403 = vmatpush3.bf16.msra.mxu0 %v2402_v38  ;;  %2407 = vmatprep.subr.bf16.mxu1 %v2656_v14 }
 0x193   : > { %2097 = vmatmul.mubr.f32.vlgmr.msra.gmra.mrb[14].mxu0 %v3649_v37  ;;  %2409 = vmatpush3.bf16.msra.mxu1 %v2408_v44 }
 0x194   : > { %2410 = vmatprep.subr.bf16.mxu1 %v2656_v14 }
 0x197   : > { %2412 = vmatpush3.bf16.msra.mxu1 %v2411_v49 }
 0x198   : > { %2413 = vmatprep.subr.bf16.mxu1 %v2656_v14 }
 0x19b   : > { %2415 = vmatpush3.bf16.msra.mxu1 %v2414_v53 }
 0x19c   : > { %2416 = vmatprep.subr.bf16.mxu1 %v2656_v14 }
 0x19f   : > { %2418 = vmatpush3.bf16.msra.mxu1 %v2417_v0 }
 0x1a0   : > { %2419 = vmatprep.subr.bf16.mxu1 %v2656_v14 }
 0x1a3   : > { %2421 = vmatpush3.bf16.msra.mxu1 %v2420_v2 }
 0x1a4   : > { %2422 = vmatprep.subr.bf16.mxu1 %v2656_v14 }
 0x1a7   : > { %2424 = vmatpush3.bf16.msra.mxu1 %v2423_v5  ;;  %v1124_v5 = vrot.slane %v1111_v54, %v3481_v47 }
 0x1a8   : > { %2425 = vmatprep.subr.bf16.mxu1 %v2656_v14  ;;  %v1339_v14 = vld [vmem:[%s3869_s11] sm:$0x7] }
 0x1a9   : > { %v1344_v6 = vrot.slane %v1339_v14, %v3459_v60  ;;  %v1348_v57 = vrot.slane %v1339_v14, %v3467_v62  ;;  %v1352_v58 = vrot.slane %v1339_v14, %v3481_v47 }
 0x1ab   : > { %2427 = vmatpush3.bf16.msra.mxu1 %v2426_v61 }
 0x241   : > { %v1194_v10 = vpop.f32.mrb[8].mxu1  ;;  %v3712_v11 = vpop.f32.mrb[8].mxu0 }
 0x242   : > { %v1196_v13 = vpop.f32.mrb[9].mxu1  ;;  %v2057_v12 = vpop.f32.mrb[9].mxu0  ;;  %v1195_v25 = vadd.f32 %v1194_v10, %v1116_v22 }
 0x243   : > { %v1197_v29 = vadd.f32 %v1196_v13, %v1120_v23 }
 0x245   : > { %v1200_v63 = vpop.f32.mrb[10].mxu1  ;;  %v3714_v15 = vpop.f32.mrb[10].mxu0 }
 0x246   : > { %v1202_v16 = vpop.f32.mrb[11].mxu1  ;;  %v2060_v18 = vpop.f32.mrb[11].mxu0  ;;  %v1201_v26 = vadd.f32 %v1200_v63, %v1116_v22  ;;  %v1278_v63 = vadd.f32 %v3712_v11, %v1124_v5 }
 0x247   : > { %v1203_v30 = vadd.f32 %v1202_v16, %v1120_v23 }
 0x249   : > { %v1206_v19 = vpop.f32.mrb[12].mxu1  ;;  %v3716_v20 = vpop.f32.mrb[12].mxu0 }
 0x24a   : > { %v1208_v48 = vpop.f32.mrb[13].mxu1  ;;  %v2063_v51 = vpop.f32.mrb[13].mxu0  ;;  %v1207_v27 = vadd.f32 %v1206_v19, %v1116_v22  ;;  %v1283_v19 = vadd.f32 %v3714_v15, %v1124_v5  ;;  %v1288_v47 = vadd.f32 %v3716_v20, %v1124_v5  ;;  %v1590_v15 = vstv %s1874_s21 }
 0x24b   : > { %v1209_v31 = vadd.f32 %v1208_v48, %v1120_v23  ;;  %v1581_v22 = vadd.s32 8, %v3456_v59  ;;  %v1582_v20 = vadd.s32 16, %v3456_v59  ;;  %vm1591_vm2 = vcmp.lt.s32.totalorder %v3456_v59, %v1590_v15 }
 0x24d   : > { %vm1592_vm4 = vcmp.lt.s32.totalorder %v1581_v22, %v1590_v15  ;;  %vm1593_vm6 = vcmp.lt.s32.totalorder %v1582_v20, %v1590_v15 }
 0x261   : > { %v1422_v9 = vpop.f32.mrb[14].mxu1 }
 0x262   : > { %v1423_v17 = vadd.f32 %v1422_v9, %v1344_v6  ;;  %v1424_v24 = vpop.f32.mrb[15].mxu1  ;;  %v1570_v9 = vrot.slane %v3649_v37, %v3459_v60 }
 0x263   : > { %v1425_v21 = vadd.f32 %v1424_v24, %v1348_v57  ;;  %v1584_v57 = vstv %s1866_s20  ;;  %s3879_s20 = smul.u32 384, %s2766_s26 }
 0x264   : > { %v1500_v28 = vrot.slane %v1423_v17, %v3459_v60  ;;  %vm1585_vm1 = vcmp.ge.s32.totalorder %v3456_v59, %v1584_v57  ;;  %vm1586_vm3 = vcmp.ge.s32.totalorder %v1581_v22, %v1584_v57  ;;  %vm1587_vm5 = vcmp.ge.s32.totalorder %v1582_v20, %v1584_v57 }
 0x265   : > { %v1525_v32 = vrot.slane %v1425_v21, %v3459_v60  ;;  %vm1594_vm7 = vmand %vm1585_vm1, %vm1591_vm2  ;;  %s3771_s29 = scalar_lea.hbm %s3872_s14, %s3879_s20 }
 0x266   : > { %v1501_v33 = vadd.f32 %v1500_v28, %v1195_v25  ;;  %v1502_v35 = vadd.f32 %v1500_v28, %v1201_v26  ;;  %v1503_v36 = vadd.f32 %v1500_v28, %v1207_v27  ;;  %v1493_v38 = vpop.f32.mrb[14].mxu0  ;;  %vm1595_vm8 = vmand %vm1586_vm3, %vm1592_vm4 }
 0x267   : > { %v1526_v39 = vadd.f32 %v1525_v32, %v1197_v29  ;;  %v1527_v62 = vadd.f32 %v1525_v32, %v1203_v30  ;;  %v1528_v40 = vadd.f32 %v1525_v32, %v1209_v31  ;;  %v2098_v41 = vpop.f32.mrb[15].mxu0  ;;  %v1494_v1 = vadd.f32 %v1493_v38, %v1352_v58  ;;  %vm1596_vm9 = vmand %vm1587_vm5, %vm1593_vm6 }
 0x268   : > { %v1860_v42 = vmul.f32 -1.442695, %v1501_v33  ;;  %v1861_v43 = vmul.f32 -1.442695, %v1502_v35  ;;  %v1862_v44 = vmul.f32 -1.442695, %v1503_v36 }
 0x269   : > { %v1863_v45 = vmul.f32 -1.442695, %v1526_v39  ;;  %v1864_v46 = vmul.f32 -1.442695, %v1527_v62  ;;  %v1865_v49 = vmul.f32 -1.442695, %v1528_v40  ;;  %v1550_v8 = vrot.slane %v1494_v1, %v3459_v60 }
 0x26a   : > { %2511 = vpow2.f32 %v1860_v42  ;;  %v2541_v35 = vld [vmem:[%s3859_s1] sm:$0xff]  ;;  %v2542_v39 = vld [vmem:[%s3859_s1 + $0x10] sm:$0xff] }
 0x26b   : > { %2513 = vpow2.f32 %v1861_v43  ;;  %v2543_v40 = vld [vmem:[%s3859_s1 + $0x20] sm:$0xff] }
 0x26c   : > { %2515 = vpow2.f32 %v1862_v44 }
 0x26d   : > { %2517 = vpow2.f32 %v1863_v45 }
 0x26e   : > { %2519 = vpow2.f32 %v1864_v46 }
 0x26f   : > { %2521 = vpow2.f32 %v1865_v49 }
 0x274   : > { %v2512_v50 = vpop.eup %2511 }
 0x275   : > { %v2514_v52 = vpop.eup %2513  ;;  %v1513_v53 = vadd.f32 1.0, %v2512_v50 }
 0x276   : > { %v2516_v55 = vpop.eup %2515  ;;  %v1514_v56 = vadd.f32 1.0, %v2514_v52 }
 0x277   : > { %v1515_v0 = vadd.f32 1.0, %v2516_v55  ;;  %2523 = vrcp.f32 %v1513_v53  ;;  %v2518_v2 = vpop.eup %2517 }
 0x278   : > { %2525 = vrcp.f32 %v1514_v56  ;;  %v2520_v3 = vpop.eup %2519  ;;  %v1538_v7 = vadd.f32 1.0, %v2518_v2 }
 0x279   : > { %2527 = vrcp.f32 %v1515_v0  ;;  %v2522_v4 = vpop.eup %2521  ;;  %v1539_v61 = vadd.f32 1.0, %v2520_v3 }
 0x27a   : > { %v1540_v10 = vadd.f32 1.0, %v2522_v4  ;;  %2529 = vrcp.f32 %v1538_v7 }
 0x27b   : > { %2531 = vrcp.f32 %v1539_v61 }
 0x27c   : > { %2533 = vrcp.f32 %v1540_v10 }
 0x281   : > { %v2524_v13 = vpop.eup %2523 }
 0x282   : > { %v2526_v12 = vpop.eup %2525  ;;  %v1551_v16 = vmul.f32 %v2524_v13, %v1550_v8 }
 0x283   : > { %v2528_v18 = vpop.eup %2527  ;;  %v1552_v48 = vmul.f32 %v2526_v12, %v1550_v8 }
 0x284   : > { %v1553_v51 = vmul.f32 %v2528_v18, %v1550_v8  ;;  %v1554_v14 = vadd.f32 %v1551_v16, %v1278_v63  ;;  %v2530_v11 = vpop.eup %2529 }
 0x285   : > { %v1555_v54 = vadd.f32 %v1552_v48, %v1283_v19  ;;  %v2532_v23 = vpop.eup %2531  ;;  %v1560_v24 = vsub.f32 1.0, %v2530_v11  ;;  %v1572_v28 = vmul.f32 %v2530_v11, %v1570_v9 }
 0x286   : > { %v1556_v6 = vadd.f32 %v1553_v51, %v1288_v47  ;;  %2535 = vtanh.f32 %v1554_v14  ;;  %v2534_v17 = vpop.eup %2533  ;;  %v1561_v25 = vsub.f32 1.0, %v2532_v23  ;;  %v1573_v37 = vmul.f32 %v2532_v23, %v1570_v9 }
 0x287   : > { %2537 = vtanh.f32 %v1555_v54  ;;  %v1562_v29 = vsub.f32 1.0, %v2534_v17  ;;  %v1574_v33 = vmul.f32 %v2534_v17, %v1570_v9 }
 0x288   : > { %2539 = vtanh.f32 %v1556_v6 }
 0x290   : > { %v2536_v21 = vpop.eup %2535 }
 0x291   : > { %v2538_v26 = vpop.eup %2537  ;;  %v1563_v27 = vmul.f32 %v2536_v21, %v1560_v24 }
 0x292   : > { %v2540_v30 = vpop.eup %2539  ;;  %v1564_v60 = vmul.f32 %v2538_v26, %v1561_v25 }
 0x293   : > { %v1575_v31 = vadd.f32 %v1572_v28, %v1563_v27  ;;  %v1565_v32 = vmul.f32 %v2540_v30, %v1562_v29 }
 0x294   : > { %v1576_v59 = vadd.f32 %v1573_v37, %v1564_v60 }
 0x295   : > { %v1603_v36 = vsel %vm1594_vm7, %v2541_v35, %v1575_v31  ;;  %v1577_v38 = vadd.f32 %v1574_v33, %v1565_v32 }
 0x296   : > { %1606 = vst [vmem:[%s478_s24] sm:$0xff] %v1603_v36  ;;  %2132 = vmatmul.mubr.f32.vlgmr.msra.gmra.mrb[16].mxu1 %v1603_v36  ;;  %v1604_v62 = vsel %vm1595_vm8, %v2542_v39, %v1576_v59 }
 0x297   : > { %2134 = vmatprep.mubr.msk.f32.mxu1 %vm2657_vm0, %v2655_v34  ;;  %1607 = vst [vmem:[%s478_s24 + $0x8] sm:$0xff] %v1604_v62  ;;  %v1605_v41 = vsel %vm1596_vm9, %v2543_v40, %v1577_v38 }
 0x298   : > { %1608 = vst [vmem:[%s478_s24 + $0x10] sm:$0xff] %v1605_v41  ;;  %s2560_s24 = sshll.u32 %s2658_s23, 4  ;;  %s2561_s24 = int_to_ptr.vmem [resolvable:$false] %s2560_s24 }
 0x299   : > { %s2562_s19 = scalar_lea.vmem %s2561_s24, 768  ;;  %p2563_p5 = scmp.lt.s32.totalorder %s3763_s18, %s2561_s24 }
 0x29a   : > { %2135 = vmatmul.mubr.f32.gmra.mrb[18].mxu1 %v1604_v62  ;;  %p2564_p6 = scmp.lt.s32.totalorder %s2562_s19, %s2556_s30 }
 0x29b   : > { %2137 = vmatprep.mubr.msk.f32.mxu1 %vm2657_vm0, %v2655_v34 }
 0x29c   : > { %p2565_p7 = por %p2564_p6, %p2563_p5 }
 0x29e   : > { %2138 = vmatmul.mubr.f32.gmra.mrb[20].mxu1 %v1605_v41  ;;  %p2566_p8 = pnand %p2565_p7, %p2559_p4 }
 0x2a0   : > { %2569 = shalt.err (!%p2566_p8)
}
 0x2a1   : > { %s2570_s21 = scalar_lea.hbm %s3771_s29, 384  ;;  %s2574_s23 = scalar_lea.hbm %s3872_s14, 768 }
 0x2a2   : > { %p2571_p9 = scmp.ne.s32.totalorder %s3771_s29, %s2570_s21  ;;  %p2575_p0 = scmp.lt.u32.totalorder %s3771_s29, %s3872_s14 }
 0x2a3   : > { %p2576_p1 = scmp.lt.u32.totalorder %s2574_s23, %s2570_s21  ;;  %p2578_p3 = scmp.lt.u32.totalorder %s2570_s21, %s3771_s29 }
 0x2a4   : > { %p2572_p12 = pnand %p2571_p9, %p2783_p10 }
 0x2a5   : > { %p2577_p2 = por %p2576_p1, %p2575_p0 }
 0x2a6   : > { %p2573_p13 = pneg %p2572_p12 }
 0x2a7   : > { %p2579_p4 = por %p2578_p3, %p2577_p2 }
 0x2a9   : > { %p2580_p5 = pnand %p2579_p4, %p2573_p13 }
 0x2ab   : > { %2583 = shalt.err (!%p2580_p5)
}
 0x2ac   : > { %s3881_s30 = smov 128   ;;  %s3882_s19 = smov 8   ;;  %v1868_v34 = vld [vmem:[%s3871_s13] ss:$0 sm:$0xff] }
 0x2ad   : > { %2431 = dma.vmem_to_hbm [thread:$0]  (%p2783_p10), %s3763_s18, 384, %s3771_s29, %s1716_s28, %s3881_s30, %s3881_s30, %s3882_s19  }
 0x2ae   : > { %s3890_s21 = smul.u32 24, %s3738_s22  ;;  %s1721_s27 = scalar_lea.sflag [#allocation7], %s3738_s22 }
 0x2af   : > { %s3891_s18 = smul.u32 384, %s2766_s26 }
 0x2b0   : > { %s485_s16 = scalar_lea.vmem [#allocation6], %s3890_s21  ;;  %s2661_s21 = smov [#allocation6]  }
 0x2b1   : > { %s1750_s23 = sshll.u32 %s485_s16, 4  ;;  %s3812_s24 = scalar_lea.hbm %s3873_s15, %s3891_s18  ;;  %s3805_s23 = int_to_ptr.vmem [resolvable:$true] %s1750_s23 }
 0x2b2   : > { %s2584_s20 = scalar_lea.vmem %s3805_s23, 384  ;;  %s2588_s30 = sshll.u32 %s2661_s21, 4  ;;  %s2589_s30 = int_to_ptr.vmem [resolvable:$false] %s2588_s30 }
 0x2b3   : > { %p2585_p6 = scmp.ne.s32.totalorder %s3805_s23, %s2584_s20  ;;  %s2590_s19 = scalar_lea.vmem %s2589_s30, 768 }
 0x2b4   : > { %p2591_p9 = scmp.lt.s32.totalorder %s3805_s23, %s2589_s30  ;;  %p2592_p12 = scmp.lt.s32.totalorder %s2590_s19, %s2584_s20 }
 0x2b5   : > { %p2586_p7 = pnand %p2585_p6, %p2783_p10 }
 0x2b6   : > { %p2593_p13 = por %p2592_p12, %p2591_p9 }
 0x2b7   : > { %p2587_p8 = pneg %p2586_p7 }
 0x2b9   : > { %p2594_p0 = pnand %p2593_p13, %p2587_p8 }
 0x369   : > { %v1698_v42 = vpop.f32.mrb[16].mxu1 }
 0x36a   : > { %v1699_v43 = vadd.f32 %v1868_v34, %v1698_v42  ;;  %v2133_v44 = vpop.f32.mrb[17].mxu1 }
 0x36c   : > { %1712 = vst [vmem:[%s485_s16] sm:$0xff] %v1699_v43 }
 0x36d   : > { %v1703_v45 = vpop.f32.mrb[18].mxu1 }
 0x36e   : > { %v1704_v46 = vadd.f32 %v1868_v34, %v1703_v45  ;;  %v2136_v49 = vpop.f32.mrb[19].mxu1 }
 0x370   : > { %1713 = vst [vmem:[%s485_s16 + $0x8] sm:$0xff] %v1704_v46 }
 0x371   : > { %v1708_v50 = vpop.f32.mrb[20].mxu1 }
 0x372   : > { %v1709_v52 = vadd.f32 %v1868_v34, %v1708_v50  ;;  %v2139_v53 = vpop.f32.mrb[21].mxu1 }
 0x374   : > { %1714 = vst [vmem:[%s485_s16 + $0x10] sm:$0xff] %v1709_v52 }
 0x375   : > { %2597 = shalt.err (!%p2594_p0)
}
 0x376   : > { %s2598_s26 = scalar_lea.hbm %s3812_s24, 384  ;;  %s2602_s29 = scalar_lea.hbm %s3873_s15, 768 }
 0x377   : > { %p2599_p1 = scmp.ne.s32.totalorder %s3812_s24, %s2598_s26  ;;  %p2603_p4 = scmp.lt.u32.totalorder %s3812_s24, %s3873_s15 }
 0x378   : > { %p2604_p5 = scmp.lt.u32.totalorder %s2602_s29, %s2598_s26  ;;  %p2606_p7 = scmp.lt.u32.totalorder %s2598_s26, %s3812_s24 }
 0x379   : > { %p2600_p2 = pnand %p2599_p1, %p2783_p10 }
 0x37a   : > { %p2605_p6 = por %p2604_p5, %p2603_p4 }
 0x37b   : > { %p2601_p3 = pneg %p2600_p2 }
 0x37c   : > { %p2607_p8 = por %p2606_p7, %p2605_p6 }
 0x37e   : > { %p2608_p9 = pnand %p2607_p8, %p2601_p3 }
 0x380   : > { %2611 = shalt.err (!%p2608_p9)
}
 0x381   : > { %s3892_s19 = smov 8   ;;  %s3893_s20 = smov 128  }
 0x382   : > { %2432 = dma.vmem_to_hbm [thread:$0]  (%p2783_p10), %s3805_s23, 384, %s3812_s24, %s1721_s27, %s3893_s20, %s3893_s20, %s3892_s19  }
 0x383 PF: > { %s3894_s21 = sld [smem:[#allocation11_spill]]  ;;  %p2442_p12 = scmp.ge.s32.totalorder %s2652_s25, 2 }
 0x385   : > { %p2436_p13 = pnand %p2442_p12, %p2787_p11 }
 0x389   : > { %s1765_s18 = sand.u32 1, %s3894_s21  }
 0x38a   : > { %s1766_s26 = scalar_lea.sflag [#allocation5], %s1765_s18 }
 0x38b   : > { %2631 = dma.done.wait (!%p2436_p13), %s1766_s26, 384  }
 0x38c   : > { %2633 = vsyncadd (!%p2436_p13), %s1766_s26, 4294966912  ;;  %s1775_s17 = scalar_lea.sflag [#allocation7], %s1765_s18 }
 0x38d   : > { %2635 = dma.done.wait (!%p2436_p13), %s1775_s17, 384  }
 0x38e   : > { %2637 = vsyncadd (!%p2436_p13), %s1775_s17, 4294966912  ;;  %s3896_s25 = sld [smem:[#allocation13_spill]]  ;;  %s3897_s22 = sld [smem:[#allocation12_spill]] }
 0x38f   : > { %s3898_s24 = sld [smem:[#allocation14_spill]]  ;;  %s3899_s23 = smov %s2644_s0 }
 0x394   : > { %p35_p10 = scmp.ge.s32.totalorder %s3896_s25, 4   ;;  %s3900_s0 = smov %s3897_s22 }
 0x396   :  { %37 = sbr.rel (!%p35_p10) target bundleno = 20 (0x14), region = 127 }
 0x39d   :  { %1780 = vsyncpa [#allocation5], 1 }
 0x39e   :  { %1782 = vsyncpa [#allocation5 + $0x1], 1 }
 0x39f   :  { %1783 = vsyncpa [#allocation7], 1 }
 0x3a0   :  { %1785 = vsyncpa [#allocation7 + $0x1], 1 }

</bundles_post_ra>
